<compile_context>
chip_gen: v7x
topology: tpu7x:2x2x1
jax: 0.10.0
libtpu: 0.0.40
codegen_flags: <defaults>
</compile_context>

<pallas_src>
import functools

import jax
import jax.numpy as jnp
import numpy as np
from jax import lax
from jax.experimental import pallas as pl
from jax.experimental.pallas import tpu as pltpu

_SQUASH_EPS = 1e-12


def _squash_over_data_out(s):
    """squash(s, dim=data_out).  s: (O, data_out, 1) f32."""
    sq = jnp.sum(s * s, axis=1, keepdims=True)                       # (O, 1, 1)
    # scale * s / sqrt(sq)  ==  s * sq * rsqrt(sq) / (1 + sq).
    # rsqrt / reciprocal run on the (otherwise idle) EUP instead of VALU divides;
    # the epsilon keeps all-zero capsules finite (no NaN/Inf).
    return s * (sq * lax.rsqrt(sq + _SQUASH_EPS)
                * pl.reciprocal(1.0 + sq, approx=True))


def _routing_iterations(priors, num_iterations):
    """Dynamic routing for one batch element.

    priors: (O, data_out, I) f32 with I on the lane axis.
    Returns routed capsules of shape (O, data_out).
    """
    inv_i = 1.0 / priors.shape[-1]

    # Iteration 0: logits are identically zero, so softmax over I is exactly
    # uniform (1/I) -> s is just the mean of the priors over I.  Skips one full
    # exp/max/sum pass over the (O, data_out, I) tensor.
    s = jnp.sum(priors, axis=2, keepdims=True) * inv_i               # (O, data_out, 1)
    outputs = _squash_over_data_out(s)

    logits = None
    for it in range(1, num_iterations):
        delta = priors * outputs                                      # (O, data_out, I)
        logits = delta if logits is None else logits + delta
        # softmax over the input-capsule axis (lanes).
        m = jnp.max(logits, axis=2, keepdims=True)
        e = jnp.exp(logits - m)
        probs = e * pl.reciprocal(jnp.sum(e, axis=2, keepdims=True), approx=True)
        s = jnp.sum(probs * priors, axis=2, keepdims=True)
        outputs = _squash_over_data_out(s)

    # Drop the trailing unit (lane) axis via a reduction (layout-friendly squeeze).
    return jnp.sum(outputs, axis=2)                                   # (O, data_out)


def _priors_for_batch(w, xb):
    """priors[o, d, i] = sum_k W[o, d, k, i] * x[k, i].

    w: (O, data_out, data_in, I), xb: (data_in, I).  The contraction over data_in
    is a sublane-side reduce; I stays on the lane axis throughout.
    """
    return jnp.sum(w * xb[None, None, :, :], axis=2)                  # (O, data_out, I)


def _routing_kernel(x_ref, w_ref, out_ref, *, num_iterations):
    """Inference kernel: no dropout mask input at all."""
    w = w_ref[...].astype(jnp.float32)                                # (O, data_out, data_in, I)
    outs = []
    for b in range(x_ref.shape[0]):                                   # unrolled batch tile
        xb = x_ref[b].astype(jnp.float32)                             # (data_in, I)
        priors = _priors_for_batch(w, xb)
        outs.append(_routing_iterations(priors, num_iterations))
    out_ref[...] = jnp.stack(outs, axis=0)                            # one (Bt, O, data_out) store


def _routing_kernel_dropout(seed_ref, x_ref, w_ref, out_ref, *,
                            num_iterations, keep_threshold):
    """Training kernel: Bernoulli(1 - p) mask on the priors, generated in-kernel."""
    w = w_ref[...].astype(jnp.float32)
    o_caps, data_out, _, i_caps = w.shape
    # One seed per grid step; successive prng_random_bits calls advance the
    # stream, so every batch element in the tile gets an independent mask.
    pltpu.prng_seed(seed_ref[0] + pl.program_id(0))
    thresh = jnp.int32(keep_threshold)
    outs = []
    for b in range(x_ref.shape[0]):
        xb = x_ref[b].astype(jnp.float32)
        priors = _priors_for_batch(w, xb)
        bits = pltpu.bitcast(
            pltpu.prng_random_bits((o_caps * data_out, i_caps)), jnp.int32)
        # P(bits < thresh) == 1 - dropout.  No 1/(1-p) rescale, matching the
        # reference module's plain .bernoulli() mask.
        keep = (bits < thresh).astype(jnp.float32).reshape(o_caps, data_out, i_caps)
        outs.append(_routing_iterations(priors * keep, num_iterations))
    out_ref[...] = jnp.stack(outs, axis=0)


def routing_layer_forward(x, route_weights, *, num_iterations, random=False,
                          dropout=0.0, key=None, batch_tile=8,
                          weights_in_bf16=False):
    """Pallas TPU implementation of RoutingLayer.forward.

    x:             (B, data_in, num_input_capsules)  -- layout the torch module receives
    route_weights: (num_output_capsules, num_input_capsules, data_out, data_in)
    returns        (B, data_out, num_output_capsules)
    """
    B, data_in, num_in = x.shape
    num_out, num_in_w, data_out, data_in_w = route_weights.shape
    assert num_in == num_in_w and data_in == data_in_w

    w = route_weights.astype(jnp.float32)
    if random:
        assert key is not None, "random=True needs a PRNG key"
        w = w + 0.01 * jax.random.normal(key, w.shape, jnp.float32)

    # Lane-dense re-layout: (O, I, data_out, data_in) -> (O, data_out, data_in, I).
    w_r = jnp.transpose(w, (0, 2, 3, 1))
    if weights_in_bf16:
        # Optional (v6e/v7x): halves the weight HBM/VMEM footprint; the kernel
        # upcasts once per grid step.  Not recommended on v5e (no bf16 VPU).
        w_r = w_r.astype(jnp.bfloat16)

    x_f = x.astype(jnp.float32)                       # (B, data_in, I): I already on lanes

    bt = max(1, min(int(batch_tile), B))
    b_pad = ((B + bt - 1) // bt) * bt
    if b_pad != B:
        # Zero-padded batches route to exactly zero (epsilon-safe squash).
        x_f = jnp.pad(x_f, ((0, b_pad - B), (0, 0), (0, 0)))

    grid = (b_pad // bt,)
    # Grid-invariant weights: a single resident copy in VMEM (no double
    # buffering, fetched once) instead of a re-blocked, double-buffered input.
    w_spec = pl.BlockSpec(memory_space=pltpu.MemorySpace.VMEM)
    out_shape = jax.ShapeDtypeStruct((b_pad, num_out, data_out), jnp.float32)
    compiler_params = pltpu.CompilerParams(
        dimension_semantics=("parallel",),
        vmem_limit_bytes=64 * 1024 * 1024,
    )

    if float(dropout) > 0.0:
        assert key is not None, "dropout>0 needs a PRNG key"
        keep_prob = 1.0 - float(dropout)
        thresh = int(round(keep_prob * 2.0 ** 32)) - 2 ** 31
        thresh = max(-(2 ** 31), min(2 ** 31 - 1, thresh))
        seed = jax.random.randint(jax.random.fold_in(key, 1), (1,), 0,
                                  jnp.iinfo(jnp.int32).max, dtype=jnp.int32)
        kernel = functools.partial(_routing_kernel_dropout,
                                   num_iterations=num_iterations,
                                   keep_threshold=thresh)
        out = pl.pallas_call(
            kernel,
            out_shape=out_shape,
            grid_spec=pltpu.PrefetchScalarGridSpec(
                num_scalar_prefetch=1,                       # dropout seed -> SMEM
                grid=grid,
                in_specs=[
                    pl.BlockSpec((bt, data_in, num_in), lambda b, seed: (b, 0, 0)),
                    w_spec,
                ],
                out_specs=pl.BlockSpec((bt, num_out, data_out),
                                       lambda b, seed: (b, 0, 0)),
            ),
            compiler_params=compiler_params,
        )(seed, x_f, w_r)
    else:
        kernel = functools.partial(_routing_kernel, num_iterations=num_iterations)
        out = pl.pallas_call(
            kernel,
            out_shape=out_shape,
            grid_spec=pltpu.PrefetchScalarGridSpec(
                num_scalar_prefetch=0,
                grid=grid,
                in_specs=[
                    pl.BlockSpec((bt, data_in, num_in), lambda b: (b, 0, 0)),
                    w_spec,
                ],
                out_specs=pl.BlockSpec((bt, num_out, data_out),
                                       lambda b: (b, 0, 0)),
            ),
            compiler_params=compiler_params,
        )(x_f, w_r)

    out = out[:B]                                                     # (B, O, data_out)
    # torch: outputs.squeeze()[.unsqueeze(0)].transpose(2, 1) -> (B, data_out, O)
    return jnp.transpose(out, (0, 2, 1))


def routing_layer_ref(x, route_weights, num_iterations):
    """Pure-JAX reference mirroring the PyTorch forward (random=False, dropout=0)."""
    x_t = jnp.transpose(x, (0, 2, 1))                                 # (B, I, data_in)
    priors = jnp.einsum('oidk,bik->boid', route_weights, x_t)         # (B, O, I, data_out)
    logits = jnp.zeros_like(priors)
    outputs = None
    for i in range(num_iterations):
        probs = jax.nn.softmax(logits, axis=2)
        s = jnp.sum(probs * priors, axis=2, keepdims=True)            # (B, O, 1, data_out)
        sq = jnp.sum(s * s, axis=3, keepdims=True)
        outputs = sq / (1.0 + sq) * s / jnp.sqrt(sq)
        if i != num_iterations - 1:
            logits = logits + priors * outputs
    return jnp.transpose(outputs[:, :, 0, :], (0, 2, 1))              # (B, data_out, O)


if __name__ == "__main__":
    # Small shapes consistent with the capsule-net module.
    B = 2
    NUM_INPUT_CAPS = 8
    NUM_OUTPUT_CAPS = 2
    DATA_IN = 16
    DATA_OUT = 8
    NUM_ITERATIONS = 3

    key = jax.random.PRNGKey(0)
    k_w, k_x, k_n = jax.random.split(key, 3)

    route_weights = jax.random.normal(
        k_w, (NUM_OUTPUT_CAPS, NUM_INPUT_CAPS, DATA_OUT, DATA_IN), jnp.float32)
    x = jax.random.normal(k_x, (B, DATA_IN, NUM_INPUT_CAPS), jnp.float32)

    # Inference path: random=False, dropout=0 (kernel with no mask input).
    out = routing_layer_forward(
        x, route_weights, num_iterations=NUM_ITERATIONS, random=False, dropout=0.0)
    out = jax.block_until_ready(out)
    assert out.shape == (B, DATA_OUT, NUM_OUTPUT_CAPS), out.shape
    ref = routing_layer_ref(x, route_weights, NUM_ITERATIONS)
    np.testing.assert_allclose(np.asarray(out), np.asarray(ref), rtol=5e-3, atol=5e-3)

    # random=True path (wrapper-side weight noise; same kernel, same shapes).
    out_r = routing_layer_forward(
        x, route_weights, num_iterations=NUM_ITERATIONS, random=True, dropout=0.0,
        key=k_n)
    out_r = jax.block_until_ready(out_r)
    noisy_w = route_weights + 0.01 * jax.random.normal(k_n, route_weights.shape,
                                                       jnp.float32)
    ref_r = routing_layer_ref(x, noisy_w, NUM_ITERATIONS)
    np.testing.assert_allclose(np.asarray(out_r), np.asarray(ref_r),
                               rtol=5e-3, atol=5e-3)

    print("KERNEL_OK")
</pallas_src>

<mosaic_0001>
module attributes {stable_mosaic.version = 11 : i64} {
  func.func @_routing_kernel(%arg0: i32, %arg1: memref<2x16x8xf32, #tpu.memory_space<vmem>>, %arg2: memref<2x8x16x8xf32, #tpu.memory_space<vmem>>, %arg3: memref<2x2x8xf32, #tpu.memory_space<vmem>>) attributes {dimension_semantics = [#tpu.dimension_semantics<parallel>], iteration_bounds = array<i64: 1>, scalar_prefetch = 0 : i64, scratch_operands = 0 : i64, tpu.core_type = #tpu.core_type<tc>, window_params = [{transform_indices = @transform_0, window_bounds = array<i64: 2, 16, 8>}, {pipeline_mode = #tpu.pipeline_mode<synchronous>, transform_indices = @transform_1, window_bounds = array<i64: 2, 8, 16, 8>}, {transform_indices = @transform_2, window_bounds = array<i64: 2, 2, 8>}]} {
    %c0 = arith.constant 0 : index
    %c0_0 = arith.constant 0 : index
    %c0_1 = arith.constant 0 : index
    %c0_2 = arith.constant 0 : index
    %0 = vector.load %arg2[%c0, %c0_0, %c0_1, %c0_2] : memref<2x8x16x8xf32, #tpu.memory_space<vmem>>, vector<2x8x16x8xf32>
    %c0_3 = arith.constant 0 : index
    %c0_4 = arith.constant 0 : index
    %c0_5 = arith.constant 0 : index
    %1 = vector.load %arg1[%c0_3, %c0_4, %c0_5] : memref<2x16x8xf32, #tpu.memory_space<vmem>>, vector<1x16x8xf32>
    %2 = vector.shape_cast %1 : vector<1x16x8xf32> to vector<16x8xf32>
    %3 = vector.shape_cast %2 : vector<16x8xf32> to vector<1x1x16x8xf32>
    %4 = vector.broadcast %3 : vector<1x1x16x8xf32> to vector<2x8x16x8xf32>
    %5 = arith.mulf %0, %4 : vector<2x8x16x8xf32>
    %cst = arith.constant dense<0.000000e+00> : vector<2x8x8xf32>
    %6 = vector.multi_reduction <add>, %5, %cst [2] : vector<2x8x16x8xf32> to vector<2x8x8xf32>
    %cst_6 = arith.constant dense<0.000000e+00> : vector<2x8xf32>
    %7 = vector.multi_reduction <add>, %6, %cst_6 [2] : vector<2x8x8xf32> to vector<2x8xf32>
    %8 = vector.shape_cast %7 : vector<2x8xf32> to vector<2x8x1xf32>
    %cst_7 = arith.constant 1.250000e-01 : f32
    %9 = vector.broadcast %cst_7 : f32 to vector<2x8x1xf32>
    %10 = arith.mulf %8, %9 : vector<2x8x1xf32>
    %11 = arith.mulf %10, %10 : vector<2x8x1xf32>
    %cst_8 = arith.constant dense<0.000000e+00> : vector<2x1xf32>
    %12 = vector.multi_reduction <add>, %11, %cst_8 [1] : vector<2x8x1xf32> to vector<2x1xf32>
    %13 = vector.shape_cast %12 : vector<2x1xf32> to vector<2x1x1xf32>
    %cst_9 = arith.constant 9.99999996E-13 : f32
    %14 = vector.broadcast %cst_9 : f32 to vector<2x1x1xf32>
    %15 = arith.addf %13, %14 : vector<2x1x1xf32>
    %16 = math.rsqrt %15 : vector<2x1x1xf32>
    %17 = arith.mulf %13, %16 : vector<2x1x1xf32>
    %cst_10 = arith.constant 1.000000e+00 : f32
    %18 = vector.broadcast %cst_10 : f32 to vector<2x1x1xf32>
    %19 = arith.addf %18, %13 : vector<2x1x1xf32>
    %20 = tpu.reciprocal %19 {approx = true} : vector<2x1x1xf32> -> vector<2x1x1xf32>
    %21 = arith.mulf %17, %20 : vector<2x1x1xf32>
    %22 = vector.broadcast %21 : vector<2x1x1xf32> to vector<2x8x1xf32>
    %23 = arith.mulf %10, %22 : vector<2x8x1xf32>
    %24 = vector.broadcast %23 : vector<2x8x1xf32> to vector<2x8x8xf32>
    %25 = arith.mulf %6, %24 : vector<2x8x8xf32>
    %cst_11 = arith.constant dense<0xFF800000> : vector<2x8xf32>
    %26 = vector.multi_reduction <maximumf>, %25, %cst_11 [2] : vector<2x8x8xf32> to vector<2x8xf32>
    %27 = vector.shape_cast %26 : vector<2x8xf32> to vector<2x8x1xf32>
    %28 = vector.broadcast %27 : vector<2x8x1xf32> to vector<2x8x8xf32>
    %29 = arith.subf %25, %28 : vector<2x8x8xf32>
    %30 = math.exp %29 : vector<2x8x8xf32>
    %cst_12 = arith.constant dense<0.000000e+00> : vector<2x8xf32>
    %31 = vector.multi_reduction <add>, %30, %cst_12 [2] : vector<2x8x8xf32> to vector<2x8xf32>
    %32 = vector.shape_cast %31 : vector<2x8xf32> to vector<2x8x1xf32>
    %33 = tpu.reciprocal %32 {approx = true} : vector<2x8x1xf32> -> vector<2x8x1xf32>
    %34 = vector.broadcast %33 : vector<2x8x1xf32> to vector<2x8x8xf32>
    %35 = arith.mulf %30, %34 : vector<2x8x8xf32>
    %36 = arith.mulf %35, %6 : vector<2x8x8xf32>
    %cst_13 = arith.constant dense<0.000000e+00> : vector<2x8xf32>
    %37 = vector.multi_reduction <add>, %36, %cst_13 [2] : vector<2x8x8xf32> to vector<2x8xf32>
    %38 = vector.shape_cast %37 : vector<2x8xf32> to vector<2x8x1xf32>
    %39 = arith.mulf %38, %38 : vector<2x8x1xf32>
    %cst_14 = arith.constant dense<0.000000e+00> : vector<2x1xf32>
    %40 = vector.multi_reduction <add>, %39, %cst_14 [1] : vector<2x8x1xf32> to vector<2x1xf32>
    %41 = vector.shape_cast %40 : vector<2x1xf32> to vector<2x1x1xf32>
    %cst_15 = arith.constant 9.99999996E-13 : f32
    %42 = vector.broadcast %cst_15 : f32 to vector<2x1x1xf32>
    %43 = arith.addf %41, %42 : vector<2x1x1xf32>
    %44 = math.rsqrt %43 : vector<2x1x1xf32>
    %45 = arith.mulf %41, %44 : vector<2x1x1xf32>
    %cst_16 = arith.constant 1.000000e+00 : f32
    %46 = vector.broadcast %cst_16 : f32 to vector<2x1x1xf32>
    %47 = arith.addf %46, %41 : vector<2x1x1xf32>
    %48 = tpu.reciprocal %47 {approx = true} : vector<2x1x1xf32> -> vector<2x1x1xf32>
    %49 = arith.mulf %45, %48 : vector<2x1x1xf32>
    %50 = vector.broadcast %49 : vector<2x1x1xf32> to vector<2x8x1xf32>
    %51 = arith.mulf %38, %50 : vector<2x8x1xf32>
    %52 = vector.broadcast %51 : vector<2x8x1xf32> to vector<2x8x8xf32>
    %53 = arith.mulf %6, %52 : vector<2x8x8xf32>
    %54 = arith.addf %25, %53 : vector<2x8x8xf32>
    %cst_17 = arith.constant dense<0xFF800000> : vector<2x8xf32>
    %55 = vector.multi_reduction <maximumf>, %54, %cst_17 [2] : vector<2x8x8xf32> to vector<2x8xf32>
    %56 = vector.shape_cast %55 : vector<2x8xf32> to vector<2x8x1xf32>
    %57 = vector.broadcast %56 : vector<2x8x1xf32> to vector<2x8x8xf32>
    %58 = arith.subf %54, %57 : vector<2x8x8xf32>
    %59 = math.exp %58 : vector<2x8x8xf32>
    %cst_18 = arith.constant dense<0.000000e+00> : vector<2x8xf32>
    %60 = vector.multi_reduction <add>, %59, %cst_18 [2] : vector<2x8x8xf32> to vector<2x8xf32>
    %61 = vector.shape_cast %60 : vector<2x8xf32> to vector<2x8x1xf32>
    %62 = tpu.reciprocal %61 {approx = true} : vector<2x8x1xf32> -> vector<2x8x1xf32>
    %63 = vector.broadcast %62 : vector<2x8x1xf32> to vector<2x8x8xf32>
    %64 = arith.mulf %59, %63 : vector<2x8x8xf32>
    %65 = arith.mulf %64, %6 : vector<2x8x8xf32>
    %cst_19 = arith.constant dense<0.000000e+00> : vector<2x8xf32>
    %66 = vector.multi_reduction <add>, %65, %cst_19 [2] : vector<2x8x8xf32> to vector<2x8xf32>
    %67 = vector.shape_cast %66 : vector<2x8xf32> to vector<2x8x1xf32>
    %68 = arith.mulf %67, %67 : vector<2x8x1xf32>
    %cst_20 = arith.constant dense<0.000000e+00> : vector<2x1xf32>
    %69 = vector.multi_reduction <add>, %68, %cst_20 [1] : vector<2x8x1xf32> to vector<2x1xf32>
    %70 = vector.shape_cast %69 : vector<2x1xf32> to vector<2x1x1xf32>
    %cst_21 = arith.constant 9.99999996E-13 : f32
    %71 = vector.broadcast %cst_21 : f32 to vector<2x1x1xf32>
    %72 = arith.addf %70, %71 : vector<2x1x1xf32>
    %73 = math.rsqrt %72 : vector<2x1x1xf32>
    %74 = arith.mulf %70, %73 : vector<2x1x1xf32>
    %cst_22 = arith.constant 1.000000e+00 : f32
    %75 = vector.broadcast %cst_22 : f32 to vector<2x1x1xf32>
    %76 = arith.addf %75, %70 : vector<2x1x1xf32>
    %77 = tpu.reciprocal %76 {approx = true} : vector<2x1x1xf32> -> vector<2x1x1xf32>
    %78 = arith.mulf %74, %77 : vector<2x1x1xf32>
    %79 = vector.broadcast %78 : vector<2x1x1xf32> to vector<2x8x1xf32>
    %80 = arith.mulf %67, %79 : vector<2x8x1xf32>
    %cst_23 = arith.constant dense<0.000000e+00> : vector<2x8xf32>
    %81 = vector.multi_reduction <add>, %80, %cst_23 [2] : vector<2x8x1xf32> to vector<2x8xf32>
    %c1 = arith.constant 1 : index
    %c0_24 = arith.constant 0 : index
    %c0_25 = arith.constant 0 : index
    %82 = vector.load %arg1[%c1, %c0_24, %c0_25] : memref<2x16x8xf32, #tpu.memory_space<vmem>>, vector<1x16x8xf32>
    %83 = vector.shape_cast %82 : vector<1x16x8xf32> to vector<16x8xf32>
    %84 = vector.shape_cast %83 : vector<16x8xf32> to vector<1x1x16x8xf32>
    %85 = vector.broadcast %84 : vector<1x1x16x8xf32> to vector<2x8x16x8xf32>
    %86 = arith.mulf %0, %85 : vector<2x8x16x8xf32>
    %cst_26 = arith.constant dense<0.000000e+00> : vector<2x8x8xf32>
    %87 = vector.multi_reduction <add>, %86, %cst_26 [2] : vector<2x8x16x8xf32> to vector<2x8x8xf32>
    %cst_27 = arith.constant dense<0.000000e+00> : vector<2x8xf32>
    %88 = vector.multi_reduction <add>, %87, %cst_27 [2] : vector<2x8x8xf32> to vector<2x8xf32>
    %89 = vector.shape_cast %88 : vector<2x8xf32> to vector<2x8x1xf32>
    %cst_28 = arith.constant 1.250000e-01 : f32
    %90 = vector.broadcast %cst_28 : f32 to vector<2x8x1xf32>
    %91 = arith.mulf %89, %90 : vector<2x8x1xf32>
    %92 = arith.mulf %91, %91 : vector<2x8x1xf32>
    %cst_29 = arith.constant dense<0.000000e+00> : vector<2x1xf32>
    %93 = vector.multi_reduction <add>, %92, %cst_29 [1] : vector<2x8x1xf32> to vector<2x1xf32>
    %94 = vector.shape_cast %93 : vector<2x1xf32> to vector<2x1x1xf32>
    %cst_30 = arith.constant 9.99999996E-13 : f32
    %95 = vector.broadcast %cst_30 : f32 to vector<2x1x1xf32>
    %96 = arith.addf %94, %95 : vector<2x1x1xf32>
    %97 = math.rsqrt %96 : vector<2x1x1xf32>
    %98 = arith.mulf %94, %97 : vector<2x1x1xf32>
    %cst_31 = arith.constant 1.000000e+00 : f32
    %99 = vector.broadcast %cst_31 : f32 to vector<2x1x1xf32>
    %100 = arith.addf %99, %94 : vector<2x1x1xf32>
    %101 = tpu.reciprocal %100 {approx = true} : vector<2x1x1xf32> -> vector<2x1x1xf32>
    %102 = arith.mulf %98, %101 : vector<2x1x1xf32>
    %103 = vector.broadcast %102 : vector<2x1x1xf32> to vector<2x8x1xf32>
    %104 = arith.mulf %91, %103 : vector<2x8x1xf32>
    %105 = vector.broadcast %104 : vector<2x8x1xf32> to vector<2x8x8xf32>
    %106 = arith.mulf %87, %105 : vector<2x8x8xf32>
    %cst_32 = arith.constant dense<0xFF800000> : vector<2x8xf32>
    %107 = vector.multi_reduction <maximumf>, %106, %cst_32 [2] : vector<2x8x8xf32> to vector<2x8xf32>
    %108 = vector.shape_cast %107 : vector<2x8xf32> to vector<2x8x1xf32>
    %109 = vector.broadcast %108 : vector<2x8x1xf32> to vector<2x8x8xf32>
    %110 = arith.subf %106, %109 : vector<2x8x8xf32>
    %111 = math.exp %110 : vector<2x8x8xf32>
    %cst_33 = arith.constant dense<0.000000e+00> : vector<2x8xf32>
    %112 = vector.multi_reduction <add>, %111, %cst_33 [2] : vector<2x8x8xf32> to vector<2x8xf32>
    %113 = vector.shape_cast %112 : vector<2x8xf32> to vector<2x8x1xf32>
    %114 = tpu.reciprocal %113 {approx = true} : vector<2x8x1xf32> -> vector<2x8x1xf32>
    %115 = vector.broadcast %114 : vector<2x8x1xf32> to vector<2x8x8xf32>
    %116 = arith.mulf %111, %115 : vector<2x8x8xf32>
    %117 = arith.mulf %116, %87 : vector<2x8x8xf32>
    %cst_34 = arith.constant dense<0.000000e+00> : vector<2x8xf32>
    %118 = vector.multi_reduction <add>, %117, %cst_34 [2] : vector<2x8x8xf32> to vector<2x8xf32>
    %119 = vector.shape_cast %118 : vector<2x8xf32> to vector<2x8x1xf32>
    %120 = arith.mulf %119, %119 : vector<2x8x1xf32>
    %cst_35 = arith.constant dense<0.000000e+00> : vector<2x1xf32>
    %121 = vector.multi_reduction <add>, %120, %cst_35 [1] : vector<2x8x1xf32> to vector<2x1xf32>
    %122 = vector.shape_cast %121 : vector<2x1xf32> to vector<2x1x1xf32>
    %cst_36 = arith.constant 9.99999996E-13 : f32
    %123 = vector.broadcast %cst_36 : f32 to vector<2x1x1xf32>
    %124 = arith.addf %122, %123 : vector<2x1x1xf32>
    %125 = math.rsqrt %124 : vector<2x1x1xf32>
    %126 = arith.mulf %122, %125 : vector<2x1x1xf32>
    %cst_37 = arith.constant 1.000000e+00 : f32
    %127 = vector.broadcast %cst_37 : f32 to vector<2x1x1xf32>
    %128 = arith.addf %127, %122 : vector<2x1x1xf32>
    %129 = tpu.reciprocal %128 {approx = true} : vector<2x1x1xf32> -> vector<2x1x1xf32>
    %130 = arith.mulf %126, %129 : vector<2x1x1xf32>
    %131 = vector.broadcast %130 : vector<2x1x1xf32> to vector<2x8x1xf32>
    %132 = arith.mulf %119, %131 : vector<2x8x1xf32>
    %133 = vector.broadcast %132 : vector<2x8x1xf32> to vector<2x8x8xf32>
    %134 = arith.mulf %87, %133 : vector<2x8x8xf32>
    %135 = arith.addf %106, %134 : vector<2x8x8xf32>
    %cst_38 = arith.constant dense<0xFF800000> : vector<2x8xf32>
    %136 = vector.multi_reduction <maximumf>, %135, %cst_38 [2] : vector<2x8x8xf32> to vector<2x8xf32>
    %137 = vector.shape_cast %136 : vector<2x8xf32> to vector<2x8x1xf32>
    %138 = vector.broadcast %137 : vector<2x8x1xf32> to vector<2x8x8xf32>
    %139 = arith.subf %135, %138 : vector<2x8x8xf32>
    %140 = math.exp %139 : vector<2x8x8xf32>
    %cst_39 = arith.constant dense<0.000000e+00> : vector<2x8xf32>
    %141 = vector.multi_reduction <add>, %140, %cst_39 [2] : vector<2x8x8xf32> to vector<2x8xf32>
    %142 = vector.shape_cast %141 : vector<2x8xf32> to vector<2x8x1xf32>
    %143 = tpu.reciprocal %142 {approx = true} : vector<2x8x1xf32> -> vector<2x8x1xf32>
    %144 = vector.broadcast %143 : vector<2x8x1xf32> to vector<2x8x8xf32>
    %145 = arith.mulf %140, %144 : vector<2x8x8xf32>
    %146 = arith.mulf %145, %87 : vector<2x8x8xf32>
    %cst_40 = arith.constant dense<0.000000e+00> : vector<2x8xf32>
    %147 = vector.multi_reduction <add>, %146, %cst_40 [2] : vector<2x8x8xf32> to vector<2x8xf32>
    %148 = vector.shape_cast %147 : vector<2x8xf32> to vector<2x8x1xf32>
    %149 = arith.mulf %148, %148 : vector<2x8x1xf32>
    %cst_41 = arith.constant dense<0.000000e+00> : vector<2x1xf32>
    %150 = vector.multi_reduction <add>, %149, %cst_41 [1] : vector<2x8x1xf32> to vector<2x1xf32>
    %151 = vector.shape_cast %150 : vector<2x1xf32> to vector<2x1x1xf32>
    %cst_42 = arith.constant 9.99999996E-13 : f32
    %152 = vector.broadcast %cst_42 : f32 to vector<2x1x1xf32>
    %153 = arith.addf %151, %152 : vector<2x1x1xf32>
    %154 = math.rsqrt %153 : vector<2x1x1xf32>
    %155 = arith.mulf %151, %154 : vector<2x1x1xf32>
    %cst_43 = arith.constant 1.000000e+00 : f32
    %156 = vector.broadcast %cst_43 : f32 to vector<2x1x1xf32>
    %157 = arith.addf %156, %151 : vector<2x1x1xf32>
    %158 = tpu.reciprocal %157 {approx = true} : vector<2x1x1xf32> -> vector<2x1x1xf32>
    %159 = arith.mulf %155, %158 : vector<2x1x1xf32>
    %160 = vector.broadcast %159 : vector<2x1x1xf32> to vector<2x8x1xf32>
    %161 = arith.mulf %148, %160 : vector<2x8x1xf32>
    %cst_44 = arith.constant dense<0.000000e+00> : vector<2x8xf32>
    %162 = vector.multi_reduction <add>, %161, %cst_44 [2] : vector<2x8x1xf32> to vector<2x8xf32>
    %163 = vector.shape_cast %81 : vector<2x8xf32> to vector<1x2x8xf32>
    %164 = vector.shape_cast %162 : vector<2x8xf32> to vector<1x2x8xf32>
    %165 = tpu.concatenate %163, %164 in 0 : vector<1x2x8xf32>, vector<1x2x8xf32> -> vector<2x2x8xf32>
    %c0_45 = arith.constant 0 : index
    %c0_46 = arith.constant 0 : index
    %c0_47 = arith.constant 0 : index
    %166 = vector.load %arg3[%c0_45, %c0_46, %c0_47] : memref<2x2x8xf32, #tpu.memory_space<vmem>>, vector<2x2x8xf32>
    tpu.vector_store %arg3[%c0_45, %c0_46, %c0_47], %165 {strides = array<i32>} : memref<2x2x8xf32, #tpu.memory_space<vmem>>, vector<2x2x8xf32>,
    return
  }
  func.func @transform_0(%arg0: i32) -> (i32, i32, i32) {
    %c0_i32 = arith.constant 0 : i32
    %c0_i32_0 = arith.constant 0 : i32
    %c0_i32_1 = arith.constant 0 : i32
    return %arg0, %c0_i32, %c0_i32_0 : i32, i32, i32
  }
  func.func @transform_1(%arg0: i32) -> (i32, i32, i32, i32) {
    %c0_i32 = arith.constant 0 : i32
    %c0_i32_0 = arith.constant 0 : i32
    %c0_i32_1 = arith.constant 0 : i32
    %c0_i32_2 = arith.constant 0 : i32
    %c0_i32_3 = arith.constant 0 : i32
    return %c0_i32, %c0_i32_0, %c0_i32_1, %c0_i32_2 : i32, i32, i32, i32
  }
  func.func @transform_2(%arg0: i32) -> (i32, i32, i32) {
    %c0_i32 = arith.constant 0 : i32
    %c0_i32_0 = arith.constant 0 : i32
    %c0_i32_1 = arith.constant 0 : i32
    return %arg0, %c0_i32, %c0_i32_0 : i32, i32, i32
  }
}

</mosaic_0001>

<bundles_post_ra>
// kernel: tpu_custom_call.1
= control target key start
LH: loop header
LB: loop body
LE: loop exit
PB: predicated region body
PF: predicated region fallthrough
CT: control target
= control target key end

     0   :  { %7 = vsyncpa [#allocation3], 0  ;;  %s3786_s0 = inlined_call_operand.hbm [shape: f32[2,16,8], index: 0, kind: input, shape index: {}]   ;;  %s3787_s1 = inlined_call_operand.hbm [shape: f32[2,8,16,8], index: 1, kind: input, shape index: {}]   ;;  %s3788_s2 = inlined_call_operand.hbm [shape: f32[2,2,8], index: 2, kind: output, shape index: {}]  }
   0x1   :  { %8 = vsyncpa [#allocation6], 0 }
   0x2   :  { %9 = vsyncpa [#allocation4], 0  ;;  %s2454_s9 = smov [#allocation2]   ;;  %s2382_s13 = scalar_lea.hbm %s3786_s0, 512 }
   0x3   :  { %s15_s10 = sshll.u32 %s2454_s9, 4  ;;  %p2383_p0 = scmp.ne.s32.totalorder %s3786_s0, %s2382_s13  ;;  %s16_s10 = int_to_ptr.vmem [resolvable:$true] %s15_s10 }
   0x4   :  { %p2386_p1 = scmp.lt.u32.totalorder %s2382_s13, %s3786_s0 }
   0x6   :  { %p2388_p2 = pnand %p2386_p1, %p2383_p0 }
   0x8   :  { %2391 = shalt.err (!%p2388_p2)
}
   0x9   :  { %s2392_s18 = scalar_lea.vmem %s16_s10, 512  ;;  %p2397_p4 = scmp.lt.s32.totalorder %s16_s10, %s16_s10 }
   0xa   :  { %p2393_p3 = scmp.ne.s32.totalorder %s16_s10, %s2392_s18  ;;  %p2398_p5 = scmp.lt.s32.totalorder %s2392_s18, %s2392_s18 }
   0xc   :  { %p2399_p6 = por %p2398_p5, %p2397_p4 }
   0xe   :  { %p2400_p7 = pnand %p2399_p6, %p2393_p3 }
  0x10   :  { %2403 = shalt.err (!%p2400_p7)
}
  0x11   :  { %s2455_s19 = smov 128   ;;  %s2456_s20 = smov 8  }
  0x12   :  { %21 = dma.hbm_to_vmem [thread:$0]  %s3786_s0, 512, %s16_s10, [#allocation3], %s2455_s19, %s2455_s19, %s2456_s20  }
  0x13   :  { %s2457_s23 = smov [#allocation5]   ;;  %s2404_s27 = scalar_lea.hbm %s3787_s1, 4096 }
  0x14   :  { %s27_s24 = sshll.u32 %s2457_s23, 4  ;;  %p2405_p8 = scmp.ne.s32.totalorder %s3787_s1, %s2404_s27  ;;  %s28_s24 = int_to_ptr.vmem [resolvable:$true] %s27_s24 }
  0x15   :  { %p2408_p9 = scmp.lt.u32.totalorder %s2404_s27, %s3787_s1 }
  0x17   :  { %p2410_p10 = pnand %p2408_p9, %p2405_p8 }
  0x19   :  { %2413 = shalt.err (!%p2410_p10)
}
  0x1a   :  { %s2414_s4 = scalar_lea.vmem %s28_s24, 4096  ;;  %p2419_p12 = scmp.lt.s32.totalorder %s28_s24, %s28_s24 }
  0x1b   :  { %p2415_p11 = scmp.ne.s32.totalorder %s28_s24, %s2414_s4  ;;  %p2420_p13 = scmp.lt.s32.totalorder %s2414_s4, %s2414_s4 }
  0x1d   :  { %p2421_p0 = por %p2420_p13, %p2419_p12 }
  0x1f   :  { %p2422_p1 = pnand %p2421_p0, %p2415_p11 }
  0x21   :  { %2425 = shalt.err (!%p2422_p1)
}
  0x22   :  { %33 = dma.hbm_to_vmem [thread:$0]  %s3787_s1, 4096, %s28_s24, [#allocation6], %s2455_s19, %s2455_s19, %s2456_s20  }
  0x23   :  { %2448 = dma.done.wait [#allocation3], 512  }
  0x24   :  { %2449 = vsyncadd [#allocation3], 4294966784 }
  0x25   :  { %2450 = dma.done.wait [#allocation6], 4096  }
  0x26   :  { %2451 = vsyncadd [#allocation6], 4294963200  ;;  %v2501_v0 = vld [vmem:[#allocation5] sm:$0xff]  ;;  %v2503_v1 = vld [vmem:[#allocation5 + $0x8] sm:$0xff]  ;;  %vm106_vm0 = vcmask 64512   ;;  %vm267_vm1 = vcmask 1041409  }
  0x27   :  { %v2505_v2 = vld [vmem:[#allocation5 + $0x10] sm:$0xff]  ;;  %v2507_v3 = vld [vmem:[#allocation5 + $0x18] sm:$0xff]  ;;  %v2509_v4 = vld [vmem:[#allocation5 + $0x20] sm:$0xff]  ;;  %vm269_vm2 = vcmask 1042434   ;;  %vm271_vm3 = vcmask 1043459   ;;  %vm273_vm4 = vcmask 1044484  }
  0x28   :  { %v2511_v5 = vld [vmem:[#allocation5 + $0x28] sm:$0xff]  ;;  %v2513_v6 = vld [vmem:[#allocation5 + $0x30] sm:$0xff]  ;;  %v2515_v7 = vld [vmem:[#allocation5 + $0x38] sm:$0xff]  ;;  %vm275_vm5 = vcmask 1045509   ;;  %vm277_vm6 = vcmask 1046534   ;;  %vm279_vm7 = vcmask 1047559  }
  0x29   :  { %v2517_v8 = vld [vmem:[#allocation5 + $0x40] sm:$0xff]  ;;  %v2519_v9 = vld [vmem:[#allocation5 + $0x48] sm:$0xff]  ;;  %v2521_v10 = vld [vmem:[#allocation5 + $0x50] sm:$0xff]  ;;  %vm2159_vm8 = vcmask 58368   ;;  %s2459_s1 = smov [#allocation7]  }
  0x2a   :  { %v2523_v11 = vld [vmem:[#allocation5 + $0x58] sm:$0xff]  ;;  %v2525_v12 = vld [vmem:[#allocation5 + $0x60] sm:$0xff]  ;;  %v2527_v13 = vld [vmem:[#allocation2 + $0x10] sm:$0xff]  ;;  %s2167_s6 = sshll.u32 %s2459_s1, 4  ;;  %s2168_s6 = int_to_ptr.vmem [resolvable:$true] %s2167_s6 }
  0x2b   :  { %v2529_v14 = vld [vmem:[#allocation2 + $0x18] sm:$0xff]  ;;  %v2531_v15 = vld [vmem:[#allocation5 + $0x68] sm:$0xff]  ;;  %v2533_v16 = vld [vmem:[#allocation5 + $0x70] sm:$0xff]  ;;  %v1103_v18 = vmul.f32 %v2527_v13, %v2501_v0  ;;  %v1105_v20 = vmul.f32 %v2527_v13, %v2505_v2  ;;  %v1107_v22 = vmul.f32 %v2527_v13, %v2509_v4  ;;  %v1109_v24 = vmul.f32 %v2527_v13, %v2513_v6  ;;  %s2426_s7 = scalar_lea.vmem %s2168_s6, 64  ;;  %p2431_p3 = scmp.lt.s32.totalorder %s2168_s6, %s2168_s6 }
  0x2c   :  { %v2535_v17 = vld [vmem:[#allocation5 + $0x78] sm:$0xff]  ;;  %v1104_v19 = vmul.f32 %v2529_v14, %v2503_v1  ;;  %v1106_v21 = vmul.f32 %v2529_v14, %v2507_v3  ;;  %v1108_v23 = vmul.f32 %v2529_v14, %v2511_v5  ;;  %v1110_v25 = vmul.f32 %v2529_v14, %v2515_v7  ;;  %p2427_p2 = scmp.ne.s32.totalorder %s2168_s6, %s2426_s7  ;;  %p2432_p4 = scmp.lt.s32.totalorder %s2426_s7, %s2426_s7 }
  0x2d   :  { %v1111_v26 = vmul.f32 %v2527_v13, %v2517_v8  ;;  %v1112_v27 = vmul.f32 %v2529_v14, %v2519_v9  ;;  %v1113_v28 = vmul.f32 %v2527_v13, %v2521_v10  ;;  %v1114_v29 = vmul.f32 %v2529_v14, %v2523_v11 }
  0x2e   :  { %v1115_v30 = vmul.f32 %v2527_v13, %v2525_v12  ;;  %v1116_v31 = vmul.f32 %v2529_v14, %v2531_v15  ;;  %v1117_v32 = vmul.f32 %v2527_v13, %v2533_v16  ;;  %v1118_v33 = vmul.f32 %v2529_v14, %v2535_v17  ;;  %p2433_p5 = por %p2432_p4, %p2431_p3 }
  0x2f   :  { %v1135_v34 = vsel %vm106_vm0, %v1103_v18, 0.0  ;;  %v1136_v35 = vsel %vm106_vm0, %v1104_v19, 0.0  ;;  %v1144_v36 = vsel %vm106_vm0, %v1105_v20, 0.0  ;;  %v1145_v37 = vsel %vm106_vm0, %v1106_v21, 0.0 }
  0x30   :  { %v1137_v38 = vadd.f32 %v1136_v35, %v1135_v34  ;;  %v1146_v39 = vadd.f32 %v1145_v37, %v1144_v36  ;;  %v1153_v40 = vsel %vm106_vm0, %v1107_v22, 0.0  ;;  %v1154_v41 = vsel %vm106_vm0, %v1108_v23, 0.0  ;;  %p2434_p6 = pnand %p2433_p5, %p2427_p2 }
  0x31   :  { %v1155_v42 = vadd.f32 %v1154_v41, %v1153_v40  ;;  %v1162_v43 = vsel %vm106_vm0, %v1109_v24, 0.0  ;;  %v1163_v44 = vsel %vm106_vm0, %v1110_v25, 0.0  ;;  %v1171_v45 = vsel %vm106_vm0, %v1111_v26, 0.0 }
  0x32   :  { %v1138_v46 = vrot.slane %v1137_v38, 4  ;;  %v1147_v47 = vrot.slane %v1146_v39, 4  ;;  %v1164_v48 = vadd.f32 %v1163_v44, %v1162_v43  ;;  %v1172_v49 = vsel %vm106_vm0, %v1112_v27, 0.0 }
  0x33   :  { %v1156_v50 = vrot.slane %v1155_v42, 4  ;;  %v1173_v51 = vadd.f32 %v1172_v49, %v1171_v45  ;;  %v1180_v52 = vsel %vm106_vm0, %v1113_v28, 0.0  ;;  %v1181_v53 = vsel %vm106_vm0, %v1114_v29, 0.0  ;;  %v2593_v49 = vld [vmem:[#allocation2 + $0x8] sm:$0xff] }
  0x34   :  { %v1139_v54 = vadd.f32 %v1138_v46, %v1137_v38  ;;  %v1148_v55 = vadd.f32 %v1147_v47, %v1146_v39  ;;  %v1165_v56 = vrot.slane %v1164_v48, 4  ;;  %v1182_v57 = vadd.f32 %v1181_v53, %v1180_v52 }
  0x35   :  { %v1157_v58 = vadd.f32 %v1156_v50, %v1155_v42  ;;  %v1174_v59 = vrot.slane %v1173_v51, 4  ;;  %v1189_v60 = vsel %vm106_vm0, %v1115_v30, 0.0  ;;  %v1190_v61 = vsel %vm106_vm0, %v1116_v31, 0.0  ;;  %v2585_v42 = vld [vmem:[#allocation2] sm:$0xff] }
  0x36   :  { %v1140_v62 = vrot.slane %v1139_v54, 2  ;;  %v1149_v63 = vrot.slane %v1148_v55, 2  ;;  %v1166_v18 = vadd.f32 %v1165_v56, %v1164_v48  ;;  %v1183_v19 = vrot.slane %v1182_v57, 4 }
  0x37   :  { %v1158_v20 = vrot.slane %v1157_v58, 2  ;;  %v1175_v21 = vadd.f32 %v1174_v59, %v1173_v51  ;;  %v1191_v22 = vadd.f32 %v1190_v61, %v1189_v60  ;;  %v1198_v23 = vsel %vm106_vm0, %v1117_v32, 0.0 }
  0x38   :  { %v1141_v24 = vadd.f32 %v1140_v62, %v1139_v54  ;;  %v1150_v25 = vadd.f32 %v1149_v63, %v1148_v55  ;;  %v1167_v26 = vrot.slane %v1166_v18, 2  ;;  %v1184_v27 = vadd.f32 %v1183_v19, %v1182_v57 }
  0x39   :  { %v1159_v28 = vadd.f32 %v1158_v20, %v1157_v58  ;;  %v1176_v29 = vrot.slane %v1175_v21, 2  ;;  %v1192_v30 = vrot.slane %v1191_v22, 4  ;;  %v1199_v31 = vsel %vm106_vm0, %v1118_v33, 0.0 }
  0x3a   :  { %v1142_v34 = vrot.slane %v1141_v24, 1  ;;  %v1151_v35 = vrot.slane %v1150_v25, 1  ;;  %v1168_v36 = vadd.f32 %v1167_v26, %v1166_v18  ;;  %v1185_v37 = vrot.slane %v1184_v27, 2 }
  0x3b   :  { %v1160_v38 = vrot.slane %v1159_v28, 1  ;;  %v1177_v39 = vadd.f32 %v1176_v29, %v1175_v21  ;;  %v1193_v40 = vadd.f32 %v1192_v30, %v1191_v22  ;;  %v1200_v41 = vadd.f32 %v1199_v31, %v1198_v23 }
  0x3c   :  { %v2587_v32 = vadd.f32 %v1142_v34, %v1141_v24  ;;  %v2589_v43 = vadd.f32 %v1151_v35, %v1150_v25  ;;  %v1169_v44 = vrot.slane %v1168_v36, 1  ;;  %v1186_v45 = vadd.f32 %v1185_v37, %v1184_v27 }
  0x3d   :  { %v2591_v46 = vadd.f32 %v1160_v38, %v1159_v28  ;;  %v1178_v33 = vrot.slane %v1177_v39, 1  ;;  %v1194_v47 = vrot.slane %v1193_v40, 2  ;;  %v1201_v48 = vrot.slane %v1200_v41, 4 }
  0x3e   :  { %3880 = vst [vmem:[#allocation11_spill] sm:$0xff] %v2587_v32  ;;  %3881 = vst [vmem:[#allocation12_spill] sm:$0xff] %v2589_v43  ;;  %v2595_v50 = vadd.f32 %v1169_v44, %v1168_v36  ;;  %v1187_v51 = vrot.slane %v1186_v45, 1  ;;  %v1295_v52 = vsel %vm267_vm1, %v2589_v43, %v2587_v32  ;;  %v74_v53 = vmul.f32 %v2585_v42, %v2501_v0 }
  0x3f   :  { %3882 = vst [vmem:[#allocation13_spill] sm:$0xff] %v2591_v46  ;;  %v2602_v54 = vadd.f32 %v1178_v33, %v1177_v39  ;;  %v1195_v55 = vadd.f32 %v1194_v47, %v1193_v40  ;;  %v1202_v56 = vadd.f32 %v1201_v48, %v1200_v41  ;;  %v1296_v57 = vsel %vm269_vm2, %v2591_v46, %v1295_v52 }
  0x40   :  { %3883 = vst [vmem:[#allocation14_spill] sm:$0xff] %v2595_v50  ;;  %v2606_v58 = vadd.f32 %v1187_v51, %v1186_v45  ;;  %v1297_v59 = vsel %vm271_vm3, %v2595_v50, %v1296_v57  ;;  %v75_v60 = vmul.f32 %v2593_v49, %v2503_v1  ;;  %v76_v61 = vmul.f32 %v2585_v42, %v2505_v2 }
  0x41   :  { %3884 = vst [vmem:[#allocation15_spill] sm:$0xff] %v2602_v54  ;;  %v1196_v62 = vrot.slane %v1195_v55, 1  ;;  %v1203_v0 = vrot.slane %v1202_v56, 2  ;;  %v1298_v63 = vsel %vm273_vm4, %v2602_v54, %v1297_v59  ;;  %v77_v18 = vmul.f32 %v2593_v49, %v2507_v3 }
  0x42   :  { %3885 = vst [vmem:[#allocation16_spill] sm:$0xff] %v2606_v58  ;;  %v1299_v19 = vsel %vm275_vm5, %v2606_v58, %v1298_v63  ;;  %v78_v20 = vmul.f32 %v2585_v42, %v2509_v4  ;;  %v79_v1 = vmul.f32 %v2593_v49, %v2511_v5  ;;  %v80_v2 = vmul.f32 %v2585_v42, %v2513_v6 }
  0x43   :  { %v2626_v21 = vadd.f32 %v1196_v62, %v1195_v55  ;;  %v1204_v22 = vadd.f32 %v1203_v0, %v1202_v56  ;;  %v81_v23 = vmul.f32 %v2593_v49, %v2515_v7  ;;  %v82_v3 = vmul.f32 %v2585_v42, %v2517_v8 }
  0x44   :  { %v83_v24 = vmul.f32 %v2593_v49, %v2519_v9  ;;  %v84_v4 = vmul.f32 %v2585_v42, %v2521_v10  ;;  %v85_v5 = vmul.f32 %v2593_v49, %v2523_v11  ;;  %v86_v6 = vmul.f32 %v2585_v42, %v2525_v12 }
  0x45   :  { %3886 = vst [vmem:[#allocation17_spill] sm:$0xff] %v2626_v21  ;;  %v1205_v25 = vrot.slane %v1204_v22, 1  ;;  %v1300_v26 = vsel %vm277_vm6, %v2626_v21, %v1299_v19  ;;  %v87_v7 = vmul.f32 %v2593_v49, %v2531_v15  ;;  %v88_v8 = vmul.f32 %v2585_v42, %v2533_v16 }
  0x46   :  { %v89_v9 = vmul.f32 %v2593_v49, %v2535_v17  ;;  %v107_v10 = vsel %vm106_vm0, %v74_v53, 0.0  ;;  %v108_v11 = vsel %vm106_vm0, %v75_v60, 0.0  ;;  %v116_v27 = vsel %vm106_vm0, %v76_v61, 0.0 }
  0x47   :  { %v2651_v12 = vadd.f32 %v1205_v25, %v1204_v22  ;;  %v109_v28 = vadd.f32 %v108_v11, %v107_v10  ;;  %v117_v29 = vsel %vm106_vm0, %v77_v18, 0.0  ;;  %v125_v30 = vsel %vm106_vm0, %v78_v20, 0.0 }
  0x48   :  { %v118_v15 = vadd.f32 %v117_v29, %v116_v27  ;;  %v126_v31 = vsel %vm106_vm0, %v79_v1, 0.0  ;;  %v134_v16 = vsel %vm106_vm0, %v80_v2, 0.0  ;;  %v135_v17 = vsel %vm106_vm0, %v81_v23, 0.0 }
  0x49   :  { %3887 = vst [vmem:[#allocation18_spill] sm:$0xff] %v2651_v12  ;;  %v1301_v34 = vsel %vm279_vm7, %v2651_v12, %v1300_v26  ;;  %v110_v35 = vrot.slane %v109_v28, 4  ;;  %v127_v36 = vadd.f32 %v126_v31, %v125_v30  ;;  %v136_v37 = vadd.f32 %v135_v17, %v134_v16  ;;  %v2675_v31 = vld [vmem:[#allocation5 + $0x88] sm:$0xff]  ;;  %v2677_v16 = vld [vmem:[#allocation5 + $0x90] sm:$0xff] }
  0x4a   :  { %v1311_v38 = vsel %vm106_vm0, %v1301_v34, 0.0  ;;  %v119_v39 = vrot.slane %v118_v15, 4  ;;  %v143_v40 = vsel %vm106_vm0, %v82_v3, 0.0  ;;  %v144_v41 = vsel %vm106_vm0, %v83_v24, 0.0 }
  0x4b   :  { %1312 = vadd.xlane.f32.xlu1 %v1311_v38  ;;  %v111_v44 = vadd.f32 %v110_v35, %v109_v28  ;;  %v128_v45 = vrot.slane %v127_v36, 4  ;;  %v137_v33 = vrot.slane %v136_v37, 4  ;;  %v145_v47 = vadd.f32 %v144_v41, %v143_v40  ;;  %v2688_v41 = vld [vmem:[#allocation5 + $0x98] sm:$0xff] }
  0x4c   :  { %v120_v48 = vadd.f32 %v119_v39, %v118_v15  ;;  %v152_v51 = vsel %vm106_vm0, %v84_v4, 0.0  ;;  %v153_v52 = vsel %vm106_vm0, %v85_v5, 0.0  ;;  %v161_v53 = vsel %vm106_vm0, %v86_v6, 0.0 }
  0x4d   :  { %v112_v55 = vrot.slane %v111_v44, 2  ;;  %v129_v56 = vadd.f32 %v128_v45, %v127_v36  ;;  %v138_v57 = vadd.f32 %v137_v33, %v136_v37  ;;  %v146_v59 = vrot.slane %v145_v47, 4  ;;  %v2692_v45 = vld [vmem:[#allocation5 + $0xa8] sm:$0xff] }
  0x4e   :  { %v121_v60 = vrot.slane %v120_v48, 2  ;;  %v154_v61 = vadd.f32 %v153_v52, %v152_v51  ;;  %v162_v62 = vsel %vm106_vm0, %v87_v7, 0.0  ;;  %v170_v0 = vsel %vm106_vm0, %v88_v8, 0.0  ;;  %v2669_v7 = vld [vmem:[#allocation5 + $0x80] sm:$0xff]  ;;  %v2700_v51 = vld [vmem:[#allocation5 + $0xb8] sm:$0xff] }
  0x4f   :  { %v113_v63 = vadd.f32 %v112_v55, %v111_v44  ;;  %v130_v18 = vrot.slane %v129_v56, 2  ;;  %v139_v19 = vrot.slane %v138_v57, 2  ;;  %v147_v20 = vadd.f32 %v146_v59, %v145_v47  ;;  %v2690_v44 = vld [vmem:[#allocation5 + $0xa0] sm:$0xff] }
  0x50   :  { %v122_v1 = vadd.f32 %v121_v60, %v120_v48  ;;  %v155_v2 = vrot.slane %v154_v61, 4  ;;  %v163_v22 = vadd.f32 %v162_v62, %v161_v53  ;;  %v171_v23 = vsel %vm106_vm0, %v89_v9, 0.0  ;;  %v2698_v48 = vld [vmem:[#allocation5 + $0xb0] sm:$0xff]  ;;  %v2708_v60 = vld [vmem:[#allocation5 + $0xc0] sm:$0xff] }
  0x51   :  { %v114_v3 = vrot.slane %v113_v63, 1  ;;  %v131_v24 = vadd.f32 %v130_v18, %v129_v56  ;;  %v140_v4 = vadd.f32 %v139_v19, %v138_v57  ;;  %v148_v5 = vrot.slane %v147_v20, 2  ;;  %v2712_v62 = vld [vmem:[#allocation5 + $0xd0] sm:$0xff]  ;;  %v2718_v18 = vld [vmem:[#allocation5 + $0xe0] sm:$0xff] }
  0x52   :  { %v123_v6 = vrot.slane %v122_v1, 1  ;;  %v156_v25 = vadd.f32 %v155_v2, %v154_v61  ;;  %v164_v26 = vrot.slane %v163_v22, 4  ;;  %v172_v10 = vadd.f32 %v171_v23, %v170_v0  ;;  %v2710_v61 = vld [vmem:[#allocation5 + $0xc8] sm:$0xff] }
  0x53   :  { %v2671_v8 = vadd.f32 %v114_v3, %v113_v63  ;;  %v132_v11 = vrot.slane %v131_v24, 1  ;;  %v141_v27 = vrot.slane %v140_v4, 1  ;;  %v149_v28 = vadd.f32 %v148_v5, %v147_v20  ;;  %v2716_v63 = vld [vmem:[#allocation5 + $0xd8] sm:$0xff]  ;;  %v2728_v3 = vld [vmem:[#allocation5 + $0xe8] sm:$0xff] }
  0x54   :  { %v2673_v29 = vadd.f32 %v123_v6, %v122_v1  ;;  %v157_v30 = vrot.slane %v156_v25, 2  ;;  %v165_v15 = vadd.f32 %v164_v26, %v163_v22  ;;  %v173_v9 = vrot.slane %v172_v10, 4 }
  0x55   :  { %v2679_v17 = vadd.f32 %v132_v11, %v131_v24  ;;  %v2681_v34 = vadd.f32 %v141_v27, %v140_v4  ;;  %v150_v35 = vrot.slane %v149_v28, 1  ;;  %v1119_v36 = vmul.f32 %v2527_v13, %v2669_v7  ;;  %v2730_v24 = vld [vmem:[#allocation5 + $0xf0] sm:$0xff]  ;;  %v2732_v4 = vld [vmem:[#allocation5 + $0xf8] sm:$0xff] }
  0x56   :  { %v158_v37 = vadd.f32 %v157_v30, %v156_v25  ;;  %v166_v38 = vrot.slane %v165_v15, 2  ;;  %v174_v39 = vadd.f32 %v173_v9, %v172_v10  ;;  %v268_v40 = vsel %vm267_vm1, %v2673_v29, %v2671_v8 }
  0x57   :  { %v2694_v33 = vadd.f32 %v150_v35, %v149_v28  ;;  %v270_v47 = vsel %vm269_vm2, %v2679_v17, %v268_v40  ;;  %v1120_v52 = vmul.f32 %v2529_v14, %v2675_v31  ;;  %v1121_v53 = vmul.f32 %v2527_v13, %v2677_v16 }
  0x58   :  { %v159_v55 = vrot.slane %v158_v37, 1  ;;  %v167_v56 = vadd.f32 %v166_v38, %v165_v15  ;;  %v175_v57 = vrot.slane %v174_v39, 2  ;;  %v272_v59 = vsel %vm271_vm3, %v2681_v34, %v270_v47 }
  0x59   :  { %v274_v0 = vsel %vm273_vm4, %v2694_v33, %v272_v59  ;;  %v1122_v19 = vmul.f32 %v2529_v14, %v2688_v41  ;;  %v1123_v20 = vmul.f32 %v2527_v13, %v2690_v44  ;;  %v1124_v1 = vmul.f32 %v2529_v14, %v2692_v45 }
  0x5a   :  { %v2726_v2 = vadd.f32 %v159_v55, %v158_v37  ;;  %v168_v22 = vrot.slane %v167_v56, 1  ;;  %v176_v23 = vadd.f32 %v175_v57, %v174_v39  ;;  %v1125_v5 = vmul.f32 %v2527_v13, %v2698_v48 }
  0x5b   :  { %v1126_v6 = vmul.f32 %v2529_v14, %v2700_v51  ;;  %v1127_v25 = vmul.f32 %v2527_v13, %v2708_v60  ;;  %v1128_v26 = vmul.f32 %v2529_v14, %v2710_v61  ;;  %v1129_v10 = vmul.f32 %v2527_v13, %v2712_v62 }
  0x5c   :  { %v2744_v11 = vadd.f32 %v168_v22, %v167_v56  ;;  %v177_v27 = vrot.slane %v176_v23, 1  ;;  %v276_v28 = vsel %vm275_vm5, %v2726_v2, %v274_v0  ;;  %v1130_v30 = vmul.f32 %v2529_v14, %v2716_v63 }
  0x5d   :  { %v1131_v15 = vmul.f32 %v2527_v13, %v2718_v18  ;;  %v1132_v9 = vmul.f32 %v2529_v14, %v2728_v3  ;;  %v1133_v35 = vmul.f32 %v2527_v13, %v2730_v24  ;;  %v1134_v37 = vmul.f32 %v2529_v14, %v2732_v4 }
  0x5e   :  { %v2758_v38 = vadd.f32 %v177_v27, %v176_v23  ;;  %v278_v39 = vsel %vm277_vm6, %v2744_v11, %v276_v28  ;;  %v1207_v40 = vsel %vm106_vm0, %v1119_v36, 0.0  ;;  %v1208_v47 = vsel %vm106_vm0, %v1120_v52, 0.0 }
  0x5f   :  { %v1209_v55 = vadd.f32 %v1208_v47, %v1207_v40  ;;  %v1216_v56 = vsel %vm106_vm0, %v1121_v53, 0.0  ;;  %v1217_v57 = vsel %vm106_vm0, %v1122_v19, 0.0  ;;  %v1225_v59 = vsel %vm106_vm0, %v1123_v20, 0.0 }
  0x60   :  { %v280_v13 = vsel %vm279_vm7, %v2758_v38, %v278_v39  ;;  %v1218_v14 = vadd.f32 %v1217_v57, %v1216_v56  ;;  %v1226_v0 = vsel %vm106_vm0, %v1124_v1, 0.0  ;;  %v1234_v22 = vsel %vm106_vm0, %v1125_v5, 0.0 }
  0x61   :  { %v290_v23 = vsel %vm106_vm0, %v280_v13, 0.0  ;;  %v1210_v36 = vrot.slane %v1209_v55, 4  ;;  %v1227_v27 = vadd.f32 %v1226_v0, %v1225_v59  ;;  %v1235_v52 = vsel %vm106_vm0, %v1126_v6, 0.0 }
  0x62   :  { %291 = vadd.xlane.f32.xlu0 %v290_v23  ;;  %v1219_v53 = vrot.slane %v1218_v14, 4  ;;  %v1236_v28 = vadd.f32 %v1235_v52, %v1234_v22  ;;  %v1243_v19 = vsel %vm106_vm0, %v1127_v25, 0.0  ;;  %v1244_v20 = vsel %vm106_vm0, %v1128_v26, 0.0 }
  0x63   :  { %v1211_v40 = vadd.f32 %v1210_v36, %v1209_v55  ;;  %v1228_v39 = vrot.slane %v1227_v27, 4  ;;  %v1245_v47 = vadd.f32 %v1244_v20, %v1243_v19  ;;  %v1252_v1 = vsel %vm106_vm0, %v1129_v10, 0.0 }
  0x64   :  { %v1220_v56 = vadd.f32 %v1219_v53, %v1218_v14  ;;  %v1237_v5 = vrot.slane %v1236_v28, 4  ;;  %v1253_v57 = vsel %vm106_vm0, %v1130_v30, 0.0  ;;  %v1261_v59 = vsel %vm106_vm0, %v1131_v15, 0.0 }
  0x65   :  { %v1212_v13 = vrot.slane %v1211_v40, 2  ;;  %v1229_v6 = vadd.f32 %v1228_v39, %v1227_v27  ;;  %v1246_v0 = vrot.slane %v1245_v47, 4  ;;  %v1254_v23 = vadd.f32 %v1253_v57, %v1252_v1 }
  0x66   :  { %v1221_v22 = vrot.slane %v1220_v56, 2  ;;  %v1238_v52 = vadd.f32 %v1237_v5, %v1236_v28  ;;  %v1262_v25 = vsel %vm106_vm0, %v1132_v9, 0.0  ;;  %v1270_v26 = vsel %vm106_vm0, %v1133_v35, 0.0 }
  0x67   :  { %v1213_v55 = vadd.f32 %v1212_v13, %v1211_v40  ;;  %v1230_v36 = vrot.slane %v1229_v6, 2  ;;  %v1247_v19 = vadd.f32 %v1246_v0, %v1245_v47  ;;  %v1255_v10 = vrot.slane %v1254_v23, 4 }
  0x68   :  { %v1222_v14 = vadd.f32 %v1221_v22, %v1220_v56  ;;  %v1239_v53 = vrot.slane %v1238_v52, 2  ;;  %v1263_v20 = vadd.f32 %v1262_v25, %v1261_v59  ;;  %v1271_v30 = vsel %vm106_vm0, %v1134_v37, 0.0 }
  0x69   :  { %v1214_v15 = vrot.slane %v1213_v55, 1  ;;  %v1231_v12 = vadd.f32 %v1230_v36, %v1229_v6  ;;  %v1248_v27 = vrot.slane %v1247_v19, 2  ;;  %v1256_v39 = vadd.f32 %v1255_v10, %v1254_v23 }
  0x6a   :  { %v1223_v1 = vrot.slane %v1222_v14, 1  ;;  %v1240_v57 = vadd.f32 %v1239_v53, %v1238_v52  ;;  %v1264_v28 = vrot.slane %v1263_v20, 4  ;;  %v1272_v5 = vadd.f32 %v1271_v30, %v1270_v26 }
  0x6b   :  { %v2781_v9 = vadd.f32 %v1214_v15, %v1213_v55  ;;  %v1232_v35 = vrot.slane %v1231_v12, 1  ;;  %v1249_v40 = vadd.f32 %v1248_v27, %v1247_v19  ;;  %v1257_v13 = vrot.slane %v1256_v39, 2 }
  0x6c   :  { %v2783_v47 = vadd.f32 %v1223_v1, %v1222_v14  ;;  %v1241_v56 = vrot.slane %v1240_v57, 1  ;;  %v1265_v0 = vadd.f32 %v1264_v28, %v1263_v20  ;;  %v1273_v59 = vrot.slane %v1272_v5, 4 }
  0x6d   :  { %3888 = vst [vmem:[#allocation19_spill] sm:$0xff] %v2781_v9  ;;  %v2785_v22 = vadd.f32 %v1232_v35, %v1231_v12  ;;  %v1250_v37 = vrot.slane %v1249_v40, 1  ;;  %v1258_v6 = vadd.f32 %v1257_v13, %v1256_v39  ;;  %v90_v23 = vmul.f32 %v2585_v42, %v2669_v7 }
  0x6e   :  { %3889 = vst [vmem:[#allocation20_spill] sm:$0xff] %v2783_v47  ;;  %v2789_v52 = vadd.f32 %v1241_v56, %v1240_v57  ;;  %v1266_v25 = vrot.slane %v1265_v0, 2  ;;  %v1274_v26 = vadd.f32 %v1273_v59, %v1272_v5  ;;  %v1302_v55 = vsel %vm267_vm1, %v2783_v47, %v2781_v9 }
  0x6f   :  { %3890 = vst [vmem:[#allocation21_spill] sm:$0xff] %v2785_v22  ;;  %v2794_v36 = vadd.f32 %v1250_v37, %v1249_v40  ;;  %v1259_v19 = vrot.slane %v1258_v6, 1  ;;  %v1303_v12 = vsel %vm269_vm2, %v2785_v22, %v1302_v55  ;;  %v91_v10 = vmul.f32 %v2593_v49, %v2675_v31 }
  0x70   :  { %3891 = vst [vmem:[#allocation22_spill] sm:$0xff] %v2789_v52  ;;  %v1267_v14 = vadd.f32 %v1266_v25, %v1265_v0  ;;  %v1275_v53 = vrot.slane %v1274_v26, 2  ;;  %v1304_v7 = vsel %vm271_vm3, %v2789_v52, %v1303_v12  ;;  %v92_v20 = vmul.f32 %v2585_v42, %v2677_v16 }
  0x71   :  { %3892 = vst [vmem:[#allocation23_spill] sm:$0xff] %v2794_v36  ;;  %v2804_v30 = vadd.f32 %v1259_v19, %v1258_v6  ;;  %v1305_v15 = vsel %vm273_vm4, %v2794_v36, %v1304_v7  ;;  %v93_v27 = vmul.f32 %v2593_v49, %v2688_v41  ;;  %v94_v39 = vmul.f32 %v2585_v42, %v2690_v44 }
  0x72   :  { %v1268_v31 = vrot.slane %v1267_v14, 1  ;;  %v1276_v1 = vadd.f32 %v1275_v53, %v1274_v26  ;;  %v95_v57 = vmul.f32 %v2593_v49, %v2692_v45  ;;  %v96_v28 = vmul.f32 %v2585_v42, %v2698_v48 }
  0x73   :  { %3893 = vst [vmem:[#allocation24_spill] sm:$0xff] %v2804_v30  ;;  %v1306_v16 = vsel %vm275_vm5, %v2804_v30, %v1305_v15  ;;  %v97_v5 = vmul.f32 %v2593_v49, %v2700_v51  ;;  %v98_v41 = vmul.f32 %v2585_v42, %v2708_v60  ;;  %v99_v44 = vmul.f32 %v2593_v49, %v2710_v61 }
  0x74   :  { %v2824_v35 = vadd.f32 %v1268_v31, %v1267_v14  ;;  %v1277_v40 = vrot.slane %v1276_v1, 1  ;;  %v100_v45 = vmul.f32 %v2585_v42, %v2712_v62  ;;  %v101_v48 = vmul.f32 %v2593_v49, %v2716_v63 }
  0x75   :  { %v102_v13 = vmul.f32 %v2585_v42, %v2718_v18  ;;  %v103_v51 = vmul.f32 %v2593_v49, %v2728_v3  ;;  %v104_v60 = vmul.f32 %v2585_v42, %v2730_v24  ;;  %v105_v61 = vmul.f32 %v2593_v49, %v2732_v4 }
  0x76   :  { %3894 = vst [vmem:[#allocation25_spill] sm:$0xff] %v2824_v35  ;;  %v2838_v56 = vadd.f32 %v1277_v40, %v1276_v1  ;;  %v1307_v62 = vsel %vm277_vm6, %v2824_v35, %v1306_v16  ;;  %v179_v0 = vsel %vm106_vm0, %v90_v23, 0.0  ;;  %v180_v63 = vsel %vm106_vm0, %v91_v10, 0.0 }
  0x77   :  { %v181_v59 = vadd.f32 %v180_v63, %v179_v0  ;;  %v188_v18 = vsel %vm106_vm0, %v92_v20, 0.0  ;;  %v189_v3 = vsel %vm106_vm0, %v93_v27, 0.0  ;;  %v197_v37 = vsel %vm106_vm0, %v94_v39, 0.0 }
  0x78   :  { %3895 = vst [vmem:[#allocation26_spill] sm:$0xff] %v2838_v56  ;;  %v1308_v42 = vsel %vm279_vm7, %v2838_v56, %v1307_v62  ;;  %v190_v49 = vadd.f32 %v189_v3, %v188_v18  ;;  %v198_v24 = vsel %vm106_vm0, %v95_v57, 0.0  ;;  %v206_v4 = vsel %vm106_vm0, %v96_v28, 0.0 }
  0x79   :  { %v1314_v6 = vsel %vm106_vm0, %v1308_v42, 0.0  ;;  %v182_v23 = vrot.slane %v181_v59, 4  ;;  %v199_v25 = vadd.f32 %v198_v24, %v197_v37  ;;  %v207_v26 = vsel %vm106_vm0, %v97_v5, 0.0 }
  0x7a   :  { %1315 = vadd.xlane.f32.xlu1 %v1314_v6  ;;  %v191_v55 = vrot.slane %v190_v49, 4  ;;  %v208_v19 = vadd.f32 %v207_v26, %v206_v4  ;;  %v215_v12 = vsel %vm106_vm0, %v98_v41, 0.0  ;;  %v216_v10 = vsel %vm106_vm0, %v99_v44, 0.0 }
  0x7b   :  { %v183_v14 = vadd.f32 %v182_v23, %v181_v59  ;;  %v200_v53 = vrot.slane %v199_v25, 4  ;;  %v217_v7 = vadd.f32 %v216_v10, %v215_v12  ;;  %v224_v20 = vsel %vm106_vm0, %v100_v45, 0.0 }
  0x7c   :  { %v192_v15 = vadd.f32 %v191_v55, %v190_v49  ;;  %v209_v27 = vrot.slane %v208_v19, 4  ;;  %v225_v39 = vsel %vm106_vm0, %v101_v48, 0.0  ;;  %v233_v31 = vsel %vm106_vm0, %v102_v13, 0.0 }
  0x7d   :  { %v184_v1 = vrot.slane %v183_v14, 2  ;;  %v201_v57 = vadd.f32 %v200_v53, %v199_v25  ;;  %v218_v28 = vrot.slane %v217_v7, 4  ;;  %v226_v16 = vadd.f32 %v225_v39, %v224_v20 }
  0x7e   :  { %v193_v5 = vrot.slane %v192_v15, 2  ;;  %v210_v40 = vadd.f32 %v209_v27, %v208_v19  ;;  %v234_v41 = vsel %vm106_vm0, %v103_v51, 0.0  ;;  %v242_v44 = vsel %vm106_vm0, %v104_v60, 0.0 }
  0x7f   :  { %v185_v62 = vadd.f32 %v184_v1, %v183_v14  ;;  %v202_v0 = vrot.slane %v201_v57, 2  ;;  %v219_v63 = vadd.f32 %v218_v28, %v217_v7  ;;  %v227_v45 = vrot.slane %v226_v16, 4 }
  0x80   :  { %v194_v59 = vadd.f32 %v193_v5, %v192_v15  ;;  %v211_v18 = vrot.slane %v210_v40, 2  ;;  %v235_v3 = vadd.f32 %v234_v41, %v233_v31  ;;  %v243_v48 = vsel %vm106_vm0, %v105_v61, 0.0 }
  0x81   :  { %v186_v13 = vrot.slane %v185_v62, 1  ;;  %v203_v37 = vadd.f32 %v202_v0, %v201_v57  ;;  %v220_v42 = vrot.slane %v219_v63, 2  ;;  %v228_v49 = vadd.f32 %v227_v45, %v226_v16 }
  0x82   :  { %v195_v24 = vrot.slane %v194_v59, 1  ;;  %v212_v4 = vadd.f32 %v211_v18, %v210_v40  ;;  %v236_v6 = vrot.slane %v235_v3, 4  ;;  %v244_v23 = vadd.f32 %v243_v48, %v242_v44 }
  0x83   :  { %v2861_v51 = vadd.f32 %v186_v13, %v185_v62  ;;  %v204_v60 = vrot.slane %v203_v37, 1  ;;  %v221_v25 = vadd.f32 %v220_v42, %v219_v63  ;;  %v229_v26 = vrot.slane %v228_v49, 2 }
  0x84   :  { %v2863_v55 = vadd.f32 %v195_v24, %v194_v59  ;;  %v213_v19 = vrot.slane %v212_v4, 1  ;;  %v237_v12 = vadd.f32 %v236_v6, %v235_v3  ;;  %v245_v10 = vrot.slane %v244_v23, 4 }
  0x85   :  { %3896 = vst [vmem:[#allocation27_spill] sm:$0xff] %v2861_v51  ;;  %v2865_v14 = vadd.f32 %v204_v60, %v203_v37  ;;  %v222_v61 = vrot.slane %v221_v25, 1  ;;  %v230_v53 = vadd.f32 %v229_v26, %v228_v49 }
  0x86   :  { %v2867_v7 = vadd.f32 %v213_v19, %v212_v4  ;;  %v238_v20 = vrot.slane %v237_v12, 2  ;;  %v246_v15 = vadd.f32 %v245_v10, %v244_v23  ;;  %v281_v27 = vsel %vm267_vm1, %v2863_v55, %v2861_v51 }
  0x87   :  { %3897 = vst [vmem:[#allocation28_spill] sm:$0xff] %v2865_v14  ;;  %v2872_v39 = vadd.f32 %v222_v61, %v221_v25  ;;  %v231_v31 = vrot.slane %v230_v53, 1  ;;  %v282_v1 = vsel %vm269_vm2, %v2865_v14, %v281_v27 }
  0x88   :  { %3898 = vst [vmem:[#allocation29_spill] sm:$0xff] %v2867_v7  ;;  %v239_v57 = vadd.f32 %v238_v20, %v237_v12  ;;  %v247_v28 = vrot.slane %v246_v15, 2  ;;  %v283_v16 = vsel %vm271_vm3, %v2867_v7, %v282_v1 }
  0x89   :  { %3899 = vst [vmem:[#allocation30_spill] sm:$0xff] %v2872_v39  ;;  %v2878_v5 = vadd.f32 %v231_v31, %v230_v53  ;;  %v284_v40 = vsel %vm273_vm4, %v2872_v39, %v283_v16 }
  0x8a   :  { %v240_v41 = vrot.slane %v239_v57, 1  ;;  %v248_v44 = vadd.f32 %v247_v28, %v246_v15 }
  0x8b   :  { %3900 = vst [vmem:[#allocation31_spill] sm:$0xff] %v2878_v5  ;;  %v285_v62 = vsel %vm275_vm5, %v2878_v5, %v284_v40 }
  0x8c   :  { %v2884_v0 = vadd.f32 %v240_v41, %v239_v57  ;;  %v249_v63 = vrot.slane %v248_v44, 1 }
  0x8e   :  { %3901 = vst [vmem:[#allocation32_spill] sm:$0xff] %v2884_v0  ;;  %v2886_v45 = vadd.f32 %v249_v63, %v248_v44  ;;  %v286_v59 = vsel %vm277_vm6, %v2884_v0, %v285_v62 }
  0x90   :  { %3902 = vst [vmem:[#allocation33_spill] sm:$0xff] %v2886_v45  ;;  %v287_v18 = vsel %vm279_vm7, %v2886_v45, %v286_v59 }
  0x91   :  { %v293_v3 = vsel %vm106_vm0, %v287_v18, 0.0 }
  0x92   :  { %294 = vadd.xlane.f32.xlu0 %v293_v3 }
  0xd8   :  { %v1313_v48 = vpop.xlane.xlu1 %1312 }
  0xd9   :  { %v1317_v13 = vmul.f32 0.125, %v1313_v48 }
  0xdb   :  { %v1319_v37 = vmul.f32 %v1317_v13, %v1317_v13 }
  0xdd   :  { %v1321_v42 = vrot.slane %v1319_v37, 4 }
  0xdf   :  { %v1322_v49 = vadd.f32 %v1321_v42, %v1319_v37 }
  0xe1   :  { %v1323_v24 = vrot.slane %v1322_v49, 2 }
  0xe3   :  { %v1324_v4 = vadd.f32 %v1323_v24, %v1322_v49 }
  0xe5   :  { %v1325_v6 = vrot.slane %v1324_v4, 1 }
  0xe7   :  { %v1326_v23 = vadd.f32 %v1325_v6, %v1324_v4 }
  0xe9   :  { %v1333_v60 = vadd.f32 1e-12, %v1326_v23  ;;  %v1339_v25 = vadd.f32 1.0, %v1326_v23 }
  0xeb   :  { %2190 = vrsqrt.f32 %v1333_v60 }
  0xec   :  { %2192 = vrcp.f32 %v1339_v25 }
  0xef   :  { %v292_v26 = vpop.xlane.xlu0 %291 }
  0xf0   :  { %v296_v19 = vmul.f32 0.125, %v292_v26 }
  0xf2   :  { %v298_v12 = vmul.f32 %v296_v19, %v296_v19 }
  0xf4   :  { %v300_v10 = vrot.slane %v298_v12, 4 }
  0xf5   :  { %v2191_v61 = vpop.eup %2190 }
  0xf6   :  { %v1337_v53 = vmul.f32 %v2191_v61, %v1326_v23  ;;  %v301_v20 = vadd.f32 %v300_v10, %v298_v12  ;;  %v2193_v15 = vpop.eup %2192 }
  0xf8   :  { %v302_v27 = vrot.slane %v301_v20, 2  ;;  %v1343_v31 = vmul.f32 %v2193_v15, %v1337_v53 }
  0xfa   :  { %v303_v1 = vadd.f32 %v302_v27, %v301_v20  ;;  %v2893_v28 = vmul.f32 %v1343_v31, %v1317_v13 }
  0xfc   :  { %v304_v57 = vrot.slane %v303_v1, 1  ;;  %v1349_v44 = vrot.slane %v2893_v28, 1  ;;  %v1350_v62 = vrot.slane %v2893_v28, 2  ;;  %v1351_v13 = vrot.slane %v2893_v28, 3 }
  0xfd   :  { %v2911_v24 = vmul.f32 %v2893_v28, %v2587_v32  ;;  %v1352_v6 = vrot.slane %v2893_v28, 4  ;;  %v1353_v26 = vrot.slane %v2893_v28, 5  ;;  %v1354_v15 = vrot.slane %v2893_v28, 6 }
  0xfe   :  { %v305_v16 = vadd.f32 %v304_v57, %v303_v1  ;;  %v2898_v63 = vmul.f32 %v1349_v44, %v2589_v43  ;;  %v2903_v3 = vmul.f32 %v1350_v62, %v2591_v46  ;;  %v2917_v12 = vmul.f32 %v1351_v13, %v2595_v50 }
  0xff   :  { %3905 = vst [vmem:[#allocation36_spill] sm:$0xff] %v2911_v24  ;;  %v1355_v27 = vrot.slane %v2893_v28, 7  ;;  %v2925_v57 = vmul.f32 %v1352_v6, %v2602_v54 }
 0x100   :  { %v312_v40 = vadd.f32 1e-12, %v305_v16  ;;  %v318_v41 = vadd.f32 1.0, %v305_v16  ;;  %3903 = vst [vmem:[#allocation34_spill] sm:$0xff] %v2898_v63  ;;  %3904 = vst [vmem:[#allocation35_spill] sm:$0xff] %v2903_v3  ;;  %v1411_v37 = vrot.slane %v2898_v63, 7 }
 0x101   :  { %v1413_v23 = vrot.slane %v2903_v3, 6  ;;  %3906 = vst [vmem:[#allocation37_spill] sm:$0xff] %v2917_v12  ;;  %3907 = vst [vmem:[#allocation38_spill] sm:$0xff] %v2925_v57 }
 0x102   :  { %2194 = vrsqrt.f32 %v312_v40  ;;  %v1412_v10 = vsel %vm267_vm1, %v1411_v37, %v2911_v24  ;;  %v1415_v40 = vrot.slane %v2917_v12, 5 }
 0x103   :  { %2196 = vrcp.f32 %v318_v41  ;;  %v1414_v31 = vsel %vm269_vm2, %v1413_v23, %v1412_v10 }
 0x104   :  { %v1416_v28 = vsel %vm271_vm3, %v1415_v40, %v1414_v31 }
 0x107   :  { %v1316_v59 = vpop.xlane.xlu1 %1315 }
 0x108   :  { %v2900_v18 = vmul.f32 0.125, %v1316_v59 }
 0x10a   :  { %v1320_v48 = vmul.f32 %v2900_v18, %v2900_v18 }
 0x10c   :  { %v2195_v42 = vpop.eup %2194  ;;  %v1327_v49 = vrot.slane %v1320_v48, 4 }
 0x10d   :  { %v316_v4 = vmul.f32 %v2195_v42, %v305_v16  ;;  %v2197_v60 = vpop.eup %2196  ;;  %v2928_v16 = vmul.f32 %v1353_v26, %v2606_v58 }
 0x10e   :  { %v1328_v25 = vadd.f32 %v1327_v49, %v1320_v48 }
 0x10f   :  { %v322_v61 = vmul.f32 %v2197_v60, %v316_v4  ;;  %3908 = vst [vmem:[#allocation39_spill] sm:$0xff] %v2928_v16  ;;  %v2945_v60 = vmul.f32 %v1354_v15, %v2626_v21  ;;  %v1419_v15 = vrot.slane %v2928_v16, 3 }
 0x110   :  { %v1329_v53 = vrot.slane %v1328_v25, 2 }
 0x111   :  { %v324_v20 = vmul.f32 %v322_v61, %v296_v19  ;;  %3913 = vst [vmem:[#allocation44_spill] sm:$0xff] %v2945_v60  ;;  %v1421_v58 = vrot.slane %v2945_v60, 2 }
 0x112   :  { %v1330_v1 = vadd.f32 %v1329_v53, %v1328_v25  ;;  %v1417_v25 = vrot.slane %v2925_v57, 4 }
 0x113   :  { %v328_v41 = vrot.slane %v324_v20, 1  ;;  %v329_v44 = vrot.slane %v324_v20, 2  ;;  %v330_v62 = vrot.slane %v324_v20, 3  ;;  %v331_v59 = vrot.slane %v324_v20, 4 }
 0x114   :  { %v1331_v19 = vrot.slane %v1330_v1, 1  ;;  %v332_v48 = vrot.slane %v324_v20, 5  ;;  %v333_v13 = vrot.slane %v324_v20, 6  ;;  %v334_v37 = vrot.slane %v324_v20, 7 }
 0x115   :  { %v2933_v42 = vmul.f32 %v328_v41, %v2673_v29  ;;  %v2936_v49 = vmul.f32 %v329_v44, %v2679_v17  ;;  %v2939_v4 = vmul.f32 %v330_v62, %v2681_v34  ;;  %v2942_v23 = vmul.f32 %v331_v59, %v2694_v33 }
 0x116   :  { %v1332_v6 = vadd.f32 %v1331_v19, %v1330_v1  ;;  %v2949_v26 = vmul.f32 %v324_v20, %v2671_v8  ;;  %v2952_v10 = vmul.f32 %v332_v48, %v2726_v2  ;;  %v2957_v1 = vmul.f32 %v333_v13, %v2744_v11 }
 0x117   :  { %3909 = vst [vmem:[#allocation40_spill] sm:$0xff] %v2933_v42  ;;  %3910 = vst [vmem:[#allocation41_spill] sm:$0xff] %v2936_v49  ;;  %v390_v61 = vrot.slane %v2933_v42, 7  ;;  %v392_v53 = vrot.slane %v2936_v49, 6  ;;  %v1418_v40 = vsel %vm273_vm4, %v1417_v25, %v1416_v28  ;;  %v2962_v44 = vmul.f32 %v334_v37, %v2758_v38  ;;  %v3918_v28 = vld [vmem:[#allocation18_spill] sm:$0xff] }
 0x118   :  { %3911 = vst [vmem:[#allocation42_spill] sm:$0xff] %v2939_v4  ;;  %3912 = vst [vmem:[#allocation43_spill] sm:$0xff] %v2942_v23  ;;  %v1334_v31 = vadd.f32 1e-12, %v1332_v6  ;;  %v1340_v41 = vadd.f32 1.0, %v1332_v6  ;;  %v394_v62 = vrot.slane %v2939_v4, 5  ;;  %v2972_v25 = vmul.f32 %v1355_v27, %v3918_v28 }
 0x119   :  { %3914 = vst [vmem:[#allocation45_spill] sm:$0xff] %v2949_v26  ;;  %3915 = vst [vmem:[#allocation46_spill] sm:$0xff] %v2952_v10  ;;  %v391_v20 = vsel %vm267_vm1, %v390_v61, %v2949_v26  ;;  %v396_v19 = vrot.slane %v2942_v23, 4  ;;  %v398_v13 = vrot.slane %v2952_v10, 3  ;;  %v1420_v37 = vsel %vm275_vm5, %v1419_v15, %v1418_v40 }
 0x11a   :  { %3916 = vst [vmem:[#allocation47_spill] sm:$0xff] %v2957_v1  ;;  %3917 = vst [vmem:[#allocation48_spill] sm:$0xff] %v2962_v44  ;;  %2198 = vrsqrt.f32 %v1334_v31  ;;  %v393_v59 = vsel %vm269_vm2, %v392_v53, %v391_v20  ;;  %v400_v61 = vrot.slane %v2957_v1, 2  ;;  %v402_v31 = vrot.slane %v2962_v44, 1 }
 0x11b   :  { %v395_v48 = vsel %vm271_vm3, %v394_v62, %v393_v59  ;;  %3919 = vst [vmem:[#allocation49_spill] sm:$0xff] %v2972_v25  ;;  %2200 = vrcp.f32 %v1340_v41  ;;  %v1422_v62 = vsel %vm277_vm6, %v1421_v58, %v1420_v37  ;;  %v1423_v40 = vrot.slane %v2972_v25, 1 }
 0x11c   :  { %v397_v21 = vsel %vm273_vm4, %v396_v19, %v395_v48 }
 0x11d   :  { %v399_v53 = vsel %vm275_vm5, %v398_v13, %v397_v21  ;;  %v1424_v48 = vsel %vm279_vm7, %v1423_v40, %v1422_v62 }
 0x11e   :  { %v401_v20 = vsel %vm277_vm6, %v400_v61, %v399_v53  ;;  %v1441_v13 = vsel %vm106_vm0, %v1424_v48, -inf }
 0x11f   :  { %v295_v59 = vpop.xlane.xlu0 %294  ;;  %v403_v27 = vsel %vm279_vm7, %v402_v31, %v401_v20 }
 0x120   :  { %v297_v15 = vmul.f32 0.125, %v295_v59  ;;  %v420_v19 = vsel %vm106_vm0, %v403_v27, -inf }
 0x121   :  { %421 = vmax.xlane.f32.xlu0 %v420_v19 }
 0x122   :  { %v299_v41 = vmul.f32 %v297_v15, %v297_v15 }
 0x124   :  { %v2199_v28 = vpop.eup %2198  ;;  %v306_v21 = vrot.slane %v299_v41, 4 }
 0x125   :  { %1442 = vmax.xlane.f32.xlu0 %v1441_v13  ;;  %v1338_v61 = vmul.f32 %v2199_v28, %v1332_v6  ;;  %v2201_v58 = vpop.eup %2200 }
 0x126   :  { %v307_v53 = vadd.f32 %v306_v21, %v299_v41 }
 0x127   :  { %v1344_v54 = vmul.f32 %v2201_v58, %v1338_v61 }
 0x128   :  { %v308_v37 = vrot.slane %v307_v53, 2 }
 0x129   :  { %v1346_v59 = vmul.f32 %v1344_v54, %v2900_v18 }
 0x12a   :  { %v309_v31 = vadd.f32 %v308_v37, %v307_v53 }
 0x12b   :  { %v1356_v62 = vrot.slane %v1346_v59, 1  ;;  %v1357_v40 = vrot.slane %v1346_v59, 2  ;;  %v1358_v28 = vrot.slane %v1346_v59, 3  ;;  %v2996_v21 = vmul.f32 %v1346_v59, %v2781_v9 }
 0x12c   :  { %v310_v20 = vrot.slane %v309_v31, 1  ;;  %v1359_v61 = vrot.slane %v1346_v59, 4 }
 0x12d   :  { %v2989_v50 = vmul.f32 %v1356_v62, %v2783_v47  ;;  %v2992_v6 = vmul.f32 %v1357_v40, %v2785_v22  ;;  %3922 = vst [vmem:[#allocation52_spill] sm:$0xff] %v2996_v21  ;;  %v3000_v53 = vmul.f32 %v1358_v28, %v2789_v52 }
 0x12e   :  { %v311_v32 = vadd.f32 %v310_v20, %v309_v31  ;;  %v1360_v31 = vrot.slane %v1346_v59, 5  ;;  %v3006_v62 = vmul.f32 %v1359_v61, %v2794_v36 }
 0x12f   :  { %3920 = vst [vmem:[#allocation50_spill] sm:$0xff] %v2989_v50  ;;  %3921 = vst [vmem:[#allocation51_spill] sm:$0xff] %v2992_v6  ;;  %v1425_v48 = vrot.slane %v2989_v50, 7  ;;  %v1427_v18 = vrot.slane %v2992_v6, 6 }
 0x130   :  { %v313_v27 = vadd.f32 1e-12, %v311_v32  ;;  %v319_v19 = vadd.f32 1.0, %v311_v32  ;;  %3923 = vst [vmem:[#allocation53_spill] sm:$0xff] %v3000_v53  ;;  %3924 = vst [vmem:[#allocation54_spill] sm:$0xff] %v3006_v62  ;;  %v3010_v47 = vmul.f32 %v1360_v31, %v2804_v30 }
 0x131   :  { %v1426_v58 = vsel %vm267_vm1, %v1425_v48, %v2996_v21 }
 0x132   :  { %2202 = vrsqrt.f32 %v313_v27  ;;  %v1428_v27 = vsel %vm269_vm2, %v1427_v18, %v1426_v58  ;;  %3925 = vst [vmem:[#allocation55_spill] sm:$0xff] %v3010_v47  ;;  %v1362_v58 = vrot.slane %v1346_v59, 7  ;;  %v1433_v30 = vrot.slane %v3010_v47, 3 }
 0x133   :  { %2204 = vrcp.f32 %v319_v19  ;;  %v1361_v19 = vrot.slane %v1346_v59, 6 }
 0x13c   :  { %v2203_v41 = vpop.eup %2202 }
 0x13d   :  { %v317_v54 = vmul.f32 %v2203_v41, %v311_v32  ;;  %v2205_v13 = vpop.eup %2204  ;;  %v1429_v32 = vrot.slane %v3000_v53, 5 }
 0x13f   :  { %v323_v37 = vmul.f32 %v2205_v13, %v317_v54  ;;  %v1430_v48 = vsel %vm271_vm3, %v1429_v32, %v1428_v27 }
 0x141   :  { %v325_v20 = vmul.f32 %v323_v37, %v297_v15  ;;  %v1431_v37 = vrot.slane %v3006_v62, 4 }
 0x143   :  { %v335_v40 = vrot.slane %v325_v20, 1  ;;  %v336_v41 = vrot.slane %v325_v20, 2  ;;  %v337_v9 = vrot.slane %v325_v20, 3  ;;  %v338_v22 = vrot.slane %v325_v20, 4 }
 0x144   :  { %v339_v28 = vrot.slane %v325_v20, 5  ;;  %v340_v52 = vrot.slane %v325_v20, 6  ;;  %v341_v15 = vrot.slane %v325_v20, 7  ;;  %v3027_v31 = vmul.f32 %v325_v20, %v2861_v51 }
 0x145   :  { %v3014_v54 = vmul.f32 %v335_v40, %v2863_v55  ;;  %v3017_v18 = vmul.f32 %v336_v41, %v2865_v14  ;;  %v3020_v13 = vmul.f32 %v337_v9, %v2867_v7  ;;  %v3023_v61 = vmul.f32 %v338_v22, %v2872_v39 }
 0x146   :  { %3929 = vst [vmem:[#allocation59_spill] sm:$0xff] %v3027_v31  ;;  %v3030_v27 = vmul.f32 %v339_v28, %v2878_v5  ;;  %v3035_v41 = vmul.f32 %v340_v52, %v2884_v0  ;;  %v3038_v9 = vmul.f32 %v1361_v19, %v2824_v35  ;;  %v1432_v22 = vsel %vm273_vm4, %v1431_v37, %v1430_v48 }
 0x147   :  { %3926 = vst [vmem:[#allocation56_spill] sm:$0xff] %v3017_v18  ;;  %3927 = vst [vmem:[#allocation57_spill] sm:$0xff] %v3020_v13  ;;  %v404_v32 = vrot.slane %v3014_v54, 7  ;;  %v406_v40 = vrot.slane %v3017_v18, 6  ;;  %v3042_v59 = vmul.f32 %v341_v15, %v2886_v45  ;;  %v408_v28 = vrot.slane %v3020_v13, 5 }
 0x148   :  { %3928 = vst [vmem:[#allocation58_spill] sm:$0xff] %v3023_v61  ;;  %3930 = vst [vmem:[#allocation60_spill] sm:$0xff] %v3030_v27  ;;  %v410_v52 = vrot.slane %v3023_v61, 4  ;;  %v412_v19 = vrot.slane %v3030_v27, 3  ;;  %v3053_v48 = vmul.f32 %v1362_v58, %v2838_v56  ;;  %v1434_v15 = vsel %vm275_vm5, %v1433_v30, %v1432_v22 }
 0x149   :  { %3931 = vst [vmem:[#allocation61_spill] sm:$0xff] %v3035_v41  ;;  %3932 = vst [vmem:[#allocation62_spill] sm:$0xff] %v3038_v9  ;;  %v405_v20 = vsel %vm267_vm1, %v404_v32, %v3027_v31  ;;  %v414_v32 = vrot.slane %v3035_v41, 2  ;;  %v1435_v35 = vrot.slane %v3038_v9, 2 }
 0x14a   :  { %3933 = vst [vmem:[#allocation63_spill] sm:$0xff] %v3042_v59  ;;  %v407_v36 = vsel %vm269_vm2, %v406_v40, %v405_v20  ;;  %3934 = vst [vmem:[#allocation64_spill] sm:$0xff] %v3053_v48  ;;  %v416_v40 = vrot.slane %v3042_v59, 1  ;;  %v1437_v58 = vrot.slane %v3053_v48, 1 }
 0x14b   :  { %v409_v0 = vsel %vm271_vm3, %v408_v28, %v407_v36  ;;  %v1436_v36 = vsel %vm277_vm6, %v1435_v35, %v1434_v15 }
 0x14c   :  { %v411_v37 = vsel %vm273_vm4, %v410_v52, %v409_v0  ;;  %v1438_v0 = vsel %vm279_vm7, %v1437_v58, %v1436_v36 }
 0x14d   :  { %v413_v45 = vsel %vm275_vm5, %v412_v19, %v411_v37  ;;  %v1444_v22 = vsel %vm106_vm0, %v1438_v0, -inf }
 0x14e   :  { %v415_v20 = vsel %vm277_vm6, %v414_v32, %v413_v45 }
 0x14f   :  { %v417_v28 = vsel %vm279_vm7, %v416_v40, %v415_v20 }
 0x150   :  { %v423_v30 = vsel %vm106_vm0, %v417_v28, -inf }
 0x151   :  { %424 = vmax.xlane.f32.xlu1 %v423_v30 }
 0x155   :  { %1445 = vmax.xlane.f32.xlu1 %v1444_v22 }
 0x1ae   :  { %v422_v52 = vpop.xlane.xlu0 %421 }
 0x1af   :  { %v428_v19 = vrot.slane %v422_v52, 1  ;;  %v429_v37 = vrot.slane %v422_v52, 2  ;;  %v430_v56 = vrot.slane %v422_v52, 3  ;;  %v431_v5 = vrot.slane %v422_v52, 4 }
 0x1b0   :  { %v432_v45 = vrot.slane %v422_v52, 5  ;;  %v458_v35 = vsub.f32 %v2949_v26, %v422_v52  ;;  %v433_v36 = vrot.slane %v422_v52, 6  ;;  %v434_v28 = vrot.slane %v422_v52, 7 }
 0x1b1   :  { %v459_v15 = vsub.f32 %v2933_v42, %v428_v19  ;;  %v460_v32 = vsub.f32 %v2936_v49, %v429_v37  ;;  %v461_v40 = vsub.f32 %v2939_v4, %v430_v56  ;;  %v462_v20 = vsub.f32 %v2942_v23, %v431_v5 }
 0x1b2   :  { %v474_v58 = vmul.f32 1.442695, %v458_v35  ;;  %v1443_v30 = vpop.xlane.xlu0 %1442  ;;  %v463_v0 = vsub.f32 %v2952_v10, %v432_v45 }
 0x1b3   :  { %v476_v22 = vmul.f32 1.442695, %v459_v15  ;;  %v478_v51 = vmul.f32 1.442695, %v460_v32  ;;  %v480_v39 = vmul.f32 1.442695, %v461_v40  ;;  %v1479_v19 = vsub.f32 %v2911_v24, %v1443_v30 }
 0x1b4   :  { %2206 = vpow2.f32 %v474_v58  ;;  %v1449_v7 = vrot.slane %v1443_v30, 1  ;;  %v1450_v26 = vrot.slane %v1443_v30, 2  ;;  %v482_v37 = vmul.f32 1.442695, %v462_v20 }
 0x1b5   :  { %2208 = vpow2.f32 %v476_v22  ;;  %v1451_v49 = vrot.slane %v1443_v30, 3  ;;  %v1452_v56 = vrot.slane %v1443_v30, 4  ;;  %v1453_v5 = vrot.slane %v1443_v30, 5 }
 0x1b6   :  { %2210 = vpow2.f32 %v478_v51  ;;  %v1454_v23 = vrot.slane %v1443_v30, 6  ;;  %v1480_v52 = vsub.f32 %v2898_v63, %v1449_v7  ;;  %v1481_v45 = vsub.f32 %v2903_v3, %v1450_v26 }
 0x1b7   :  { %2212 = vpow2.f32 %v480_v39  ;;  %v1482_v35 = vsub.f32 %v2917_v12, %v1451_v49  ;;  %v1483_v15 = vsub.f32 %v2925_v57, %v1452_v56  ;;  %v1455_v32 = vrot.slane %v1443_v30, 7 }
 0x1b8   :  { %v1495_v40 = vmul.f32 1.442695, %v1479_v19  ;;  %v1497_v58 = vmul.f32 1.442695, %v1480_v52  ;;  %v464_v22 = vsub.f32 %v2957_v1, %v433_v36  ;;  %2214 = vpow2.f32 %v482_v37 }
 0x1b9   :  { %v1499_v20 = vmul.f32 1.442695, %v1481_v45  ;;  %v1501_v24 = vmul.f32 1.442695, %v1482_v35  ;;  %v465_v51 = vsub.f32 %v2962_v44, %v434_v28  ;;  %v1484_v10 = vsub.f32 %v2928_v16, %v1453_v5 }
 0x1ba   :  { %2216 = vpow2.f32 %v1495_v40  ;;  %v1503_v7 = vmul.f32 1.442695, %v1483_v15  ;;  %v484_v39 = vmul.f32 1.442695, %v463_v0  ;;  %v1485_v49 = vsub.f32 %v2945_v60, %v1454_v23 }
 0x1bb   :  { %2218 = vpow2.f32 %v1497_v58  ;;  %v486_v26 = vmul.f32 1.442695, %v464_v22  ;;  %v1486_v30 = vsub.f32 %v2972_v25, %v1455_v32  ;;  %v488_v19 = vmul.f32 1.442695, %v465_v51 }
 0x1bc   :  { %2220 = vpow2.f32 %v1499_v20  ;;  %v1505_v37 = vmul.f32 1.442695, %v1484_v10  ;;  %v1507_v28 = vmul.f32 1.442695, %v1485_v49 }
 0x1bd   :  { %2222 = vpow2.f32 %v1501_v24  ;;  %v1509_v23 = vmul.f32 1.442695, %v1486_v30 }
 0x1be   :  { %v3084_v36 = vpop.eup %2206  ;;  %2224 = vpow2.f32 %v1503_v7 }
 0x1bf   :  { %v3086_v56 = vpop.eup %2208  ;;  %2226 = vpow2.f32 %v484_v39 }
 0x1c0   :  { %v3088_v5 = vpop.eup %2210  ;;  %2228 = vpow2.f32 %v486_v26  ;;  %v522_v0 = vrot.slane %v3086_v56, 7 }
 0x1c1   :  { %v3091_v52 = vpop.eup %2212  ;;  %2230 = vpow2.f32 %v488_v19  ;;  %v524_v24 = vrot.slane %v3088_v5, 6 }
 0x1c2   :  { %v523_v45 = vsel %vm267_vm1, %v522_v0, %v3084_v36  ;;  %2232 = vpow2.f32 %v1505_v37  ;;  %v3096_v10 = vpop.eup %2214  ;;  %v526_v32 = vrot.slane %v3091_v52, 5 }
 0x1c3   :  { %v525_v35 = vsel %vm269_vm2, %v524_v24, %v523_v45  ;;  %2234 = vpow2.f32 %v1507_v28  ;;  %v528_v7 = vrot.slane %v3096_v10, 4 }
 0x1c4   :  { %v3099_v15 = vpop.eup %2216  ;;  %2236 = vpow2.f32 %v1509_v23  ;;  %v527_v22 = vsel %vm271_vm3, %v526_v32, %v525_v35 }
 0x1c5   :  { %v3102_v40 = vpop.eup %2218  ;;  %v529_v37 = vsel %vm273_vm4, %v528_v7, %v527_v22 }
 0x1c6   :  { %v3104_v58 = vpop.eup %2220  ;;  %v1543_v20 = vrot.slane %v3102_v40, 7 }
 0x1c7   :  { %v3108_v51 = vpop.eup %2222  ;;  %v1545_v39 = vrot.slane %v3104_v58, 6 }
 0x1c8   :  { %v3112_v49 = vpop.eup %2224  ;;  %v1544_v26 = vsel %vm267_vm1, %v1543_v20, %v3099_v15  ;;  %v1547_v30 = vrot.slane %v3108_v51, 5 }
 0x1c9   :  { %v3117_v19 = vpop.eup %2226  ;;  %v1546_v28 = vsel %vm269_vm2, %v1545_v39, %v1544_v26  ;;  %v1549_v45 = vrot.slane %v3112_v49, 4 }
 0x1ca   :  { %v3121_v0 = vpop.eup %2228  ;;  %v530_v23 = vrot.slane %v3117_v19, 3  ;;  %v1548_v24 = vsel %vm271_vm3, %v1547_v30, %v1546_v28 }
 0x1cb   :  { %v3126_v35 = vpop.eup %2230  ;;  %v532_v32 = vrot.slane %v3121_v0, 2  ;;  %v1550_v7 = vsel %vm273_vm4, %v1549_v45, %v1548_v24 }
 0x1cc   :  { %v3129_v20 = vpop.eup %2232  ;;  %v531_v25 = vsel %vm275_vm5, %v530_v23, %v529_v37  ;;  %v534_v22 = vrot.slane %v3126_v35, 1 }
 0x1cd   :  { %v3134_v39 = vpop.eup %2234  ;;  %v533_v26 = vsel %vm277_vm6, %v532_v32, %v531_v25  ;;  %v1551_v30 = vrot.slane %v3129_v20, 3 }
 0x1ce   :  { %v3138_v28 = vpop.eup %2236  ;;  %v535_v60 = vsel %vm279_vm7, %v534_v22, %v533_v26  ;;  %v1553_v16 = vrot.slane %v3134_v39, 2 }
 0x1cf   :  { %v552_v57 = vsel %vm106_vm0, %v535_v60, 0.0  ;;  %v1552_v37 = vsel %vm275_vm5, %v1551_v30, %v1550_v7  ;;  %v1555_v23 = vrot.slane %v3138_v28, 1 }
 0x1d0   :  { %553 = vadd.xlane.f32.xlu0 %v552_v57  ;;  %v1554_v24 = vsel %vm277_vm6, %v1553_v16, %v1552_v37 }
 0x1d1   :  { %v1556_v45 = vsel %vm279_vm7, %v1555_v23, %v1554_v24 }
 0x1d2   :  { %v1573_v25 = vsel %vm106_vm0, %v1556_v45, 0.0 }
 0x1d4   :  { %1574 = vadd.xlane.f32.xlu0 %v1573_v25 }
 0x1de   :  { %v425_v32 = vpop.xlane.xlu1 %424 }
 0x1df   :  { %v435_v12 = vrot.slane %v425_v32, 1  ;;  %v436_v3 = vrot.slane %v425_v32, 2  ;;  %v437_v22 = vrot.slane %v425_v32, 3  ;;  %v438_v26 = vrot.slane %v425_v32, 4 }
 0x1e0   :  { %v439_v63 = vrot.slane %v425_v32, 5  ;;  %v466_v60 = vsub.f32 %v3027_v31, %v425_v32  ;;  %v440_v37 = vrot.slane %v425_v32, 6  ;;  %v441_v23 = vrot.slane %v425_v32, 7 }
 0x1e1   :  { %v467_v7 = vsub.f32 %v3014_v54, %v435_v12  ;;  %v468_v30 = vsub.f32 %v3017_v18, %v436_v3  ;;  %v469_v57 = vsub.f32 %v3020_v13, %v437_v22  ;;  %v470_v16 = vsub.f32 %v3023_v61, %v438_v26 }
 0x1e2   :  { %v490_v24 = vmul.f32 1.442695, %v466_v60  ;;  %v1446_v45 = vpop.xlane.xlu1 %1445  ;;  %v471_v25 = vsub.f32 %v3030_v27, %v439_v63 }
 0x1e3   :  { %v492_v44 = vmul.f32 1.442695, %v467_v7  ;;  %v494_v1 = vmul.f32 1.442695, %v468_v30  ;;  %v496_v4 = vmul.f32 1.442695, %v469_v57  ;;  %v1487_v12 = vsub.f32 %v2996_v21, %v1446_v45 }
 0x1e4   :  { %2238 = vpow2.f32 %v490_v24  ;;  %v1456_v42 = vrot.slane %v1446_v45, 1  ;;  %v1457_v31 = vrot.slane %v1446_v45, 2  ;;  %v498_v3 = vmul.f32 1.442695, %v470_v16 }
 0x1e5   :  { %2240 = vpow2.f32 %v492_v44  ;;  %v1458_v18 = vrot.slane %v1446_v45, 3  ;;  %v1459_v22 = vrot.slane %v1446_v45, 4  ;;  %v1460_v26 = vrot.slane %v1446_v45, 5 }
 0x1e6   :  { %2242 = vpow2.f32 %v494_v1  ;;  %v1461_v61 = vrot.slane %v1446_v45, 6  ;;  %v1488_v32 = vsub.f32 %v2989_v50, %v1456_v42  ;;  %v1489_v63 = vsub.f32 %v2992_v6, %v1457_v31 }
 0x1e7   :  { %2244 = vpow2.f32 %v496_v4  ;;  %v1490_v60 = vsub.f32 %v3000_v53, %v1458_v18  ;;  %v1491_v7 = vsub.f32 %v3006_v62, %v1459_v22  ;;  %v1462_v30 = vrot.slane %v1446_v45, 7 }
 0x1e8   :  { %v1511_v57 = vmul.f32 1.442695, %v1487_v12  ;;  %v1513_v24 = vmul.f32 1.442695, %v1488_v32  ;;  %v472_v44 = vsub.f32 %v3035_v41, %v440_v37  ;;  %2246 = vpow2.f32 %v498_v3 }
 0x1e9   :  { %v1515_v16 = vmul.f32 1.442695, %v1489_v63  ;;  %v1517_v21 = vmul.f32 1.442695, %v1490_v60  ;;  %v473_v1 = vsub.f32 %v3042_v59, %v441_v23  ;;  %v1492_v27 = vsub.f32 %v3010_v47, %v1460_v26 }
 0x1ea   :  { %2248 = vpow2.f32 %v1511_v57  ;;  %v1519_v42 = vmul.f32 1.442695, %v1491_v7  ;;  %v500_v4 = vmul.f32 1.442695, %v471_v25  ;;  %v1493_v18 = vsub.f32 %v3038_v9, %v1461_v61 }
 0x1eb   :  { %2250 = vpow2.f32 %v1513_v24  ;;  %v502_v31 = vmul.f32 1.442695, %v472_v44  ;;  %v1494_v45 = vsub.f32 %v3053_v48, %v1462_v30  ;;  %v504_v12 = vmul.f32 1.442695, %v473_v1 }
 0x1ec   :  { %2252 = vpow2.f32 %v1515_v16  ;;  %v1521_v3 = vmul.f32 1.442695, %v1492_v27  ;;  %v1523_v23 = vmul.f32 1.442695, %v1493_v18 }
 0x1ed   :  { %2254 = vpow2.f32 %v1517_v21  ;;  %v1525_v61 = vmul.f32 1.442695, %v1494_v45 }
 0x1ee   :  { %v3164_v37 = vpop.eup %2238  ;;  %2256 = vpow2.f32 %v1519_v42 }
 0x1ef   :  { %v3166_v22 = vpop.eup %2240  ;;  %2258 = vpow2.f32 %v500_v4 }
 0x1f0   :  { %v3168_v26 = vpop.eup %2242  ;;  %2260 = vpow2.f32 %v502_v31  ;;  %v536_v25 = vrot.slane %v3166_v22, 7 }
 0x1f1   :  { %v3171_v32 = vpop.eup %2244  ;;  %2262 = vpow2.f32 %v504_v12  ;;  %v538_v21 = vrot.slane %v3168_v26, 6 }
 0x1f2   :  { %v537_v63 = vsel %vm267_vm1, %v536_v25, %v3164_v37  ;;  %2264 = vpow2.f32 %v1521_v3  ;;  %v3176_v27 = vpop.eup %2246  ;;  %v540_v30 = vrot.slane %v3171_v32, 5 }
 0x1f3   :  { %v539_v60 = vsel %vm269_vm2, %v538_v21, %v537_v63  ;;  %2266 = vpow2.f32 %v1523_v23  ;;  %v542_v42 = vrot.slane %v3176_v27, 4 }
 0x1f4   :  { %v3179_v7 = vpop.eup %2248  ;;  %2268 = vpow2.f32 %v1525_v61  ;;  %v541_v44 = vsel %vm271_vm3, %v540_v30, %v539_v60 }
 0x1f5   :  { %v3182_v57 = vpop.eup %2250  ;;  %v543_v3 = vsel %vm273_vm4, %v542_v42, %v541_v44 }
 0x1f6   :  { %v3184_v24 = vpop.eup %2252  ;;  %v1557_v16 = vrot.slane %v3182_v57, 7 }
 0x1f7   :  { %v3188_v1 = vpop.eup %2254  ;;  %v1559_v4 = vrot.slane %v3184_v24, 6 }
 0x1f8   :  { %v3192_v18 = vpop.eup %2256  ;;  %v1558_v31 = vsel %vm267_vm1, %v1557_v16, %v3179_v7  ;;  %v1561_v45 = vrot.slane %v3188_v1, 5 }
 0x1f9   :  { %v3197_v12 = vpop.eup %2258  ;;  %v1560_v23 = vsel %vm269_vm2, %v1559_v4, %v1558_v31  ;;  %v1563_v63 = vrot.slane %v3192_v18, 4 }
 0x1fa   :  { %v3201_v25 = vpop.eup %2260  ;;  %v544_v61 = vrot.slane %v3197_v12, 3  ;;  %v1562_v21 = vsel %vm271_vm3, %v1561_v45, %v1560_v23 }
 0x1fb   :  { %v3206_v60 = vpop.eup %2262  ;;  %v546_v30 = vrot.slane %v3201_v25, 2  ;;  %v1564_v42 = vsel %vm273_vm4, %v1563_v63, %v1562_v21 }
 0x1fc   :  { %v3209_v16 = vpop.eup %2264  ;;  %v545_v48 = vsel %vm275_vm5, %v544_v61, %v543_v3  ;;  %v548_v44 = vrot.slane %v3206_v60, 1 }
 0x1fd   :  { %v3214_v4 = vpop.eup %2266  ;;  %v547_v31 = vsel %vm277_vm6, %v546_v30, %v545_v48  ;;  %v1565_v45 = vrot.slane %v3209_v16, 3 }
 0x1fe   :  { %v3218_v23 = vpop.eup %2268  ;;  %v549_v9 = vsel %vm279_vm7, %v548_v44, %v547_v31  ;;  %v1567_v47 = vrot.slane %v3214_v4, 2 }
 0x1ff   :  { %v555_v62 = vsel %vm106_vm0, %v549_v9, 0.0  ;;  %v1566_v3 = vsel %vm275_vm5, %v1565_v45, %v1564_v42  ;;  %v1569_v61 = vrot.slane %v3218_v23, 1 }
 0x200   :  { %556 = vadd.xlane.f32.xlu1 %v555_v62  ;;  %v1568_v21 = vsel %vm277_vm6, %v1567_v47, %v1566_v3 }
 0x201   :  { %v1570_v63 = vsel %vm279_vm7, %v1569_v61, %v1568_v21 }
 0x202   :  { %v1576_v48 = vsel %vm106_vm0, %v1570_v63, 0.0 }
 0x204   :  { %1577 = vadd.xlane.f32.xlu1 %v1576_v48 }
 0x25d   :  { %v554_v30 = vpop.xlane.xlu0 %553 }
 0x25e   :  { %2270 = vrcp.f32 %v554_v30 }
 0x261   :  { %v1575_v53 = vpop.xlane.xlu0 %1574 }
 0x262   :  { %2272 = vrcp.f32 %v1575_v53 }
 0x268   :  { %v2271_v44 = vpop.eup %2270 }
 0x269   :  { %v562_v31 = vrot.slane %v2271_v44, 1  ;;  %v563_v6 = vrot.slane %v2271_v44, 2  ;;  %v564_v9 = vrot.slane %v2271_v44, 3  ;;  %v565_v50 = vrot.slane %v2271_v44, 4 }
 0x26a   :  { %v566_v42 = vrot.slane %v2271_v44, 5  ;;  %v567_v45 = vrot.slane %v2271_v44, 6  ;;  %v568_v59 = vrot.slane %v2271_v44, 7  ;;  %v592_v62 = vmul.f32 %v2271_v44, %v3084_v36 }
 0x26b   :  { %v593_v47 = vmul.f32 %v3086_v56, %v562_v31  ;;  %v594_v3 = vmul.f32 %v3088_v5, %v563_v6  ;;  %v595_v61 = vmul.f32 %v3091_v52, %v564_v9  ;;  %v596_v21 = vmul.f32 %v3096_v10, %v565_v50 }
 0x26c   :  { %v2273_v63 = vpop.eup %2272  ;;  %v597_v53 = vmul.f32 %v3117_v19, %v566_v42  ;;  %v598_v48 = vmul.f32 %v3121_v0, %v567_v45  ;;  %v599_v30 = vmul.f32 %v3126_v35, %v568_v59  ;;  %v608_v6 = vmul.f32 %v592_v62, %v2671_v8 }
 0x26d   :  { %v609_v41 = vmul.f32 %v593_v47, %v2673_v29  ;;  %v610_v13 = vmul.f32 %v594_v3, %v2679_v17  ;;  %v611_v36 = vmul.f32 %v595_v61, %v2681_v34  ;;  %v612_v56 = vmul.f32 %v596_v21, %v2694_v33 }
 0x26e   :  { %v613_v5 = vmul.f32 %v597_v53, %v2726_v2  ;;  %v614_v50 = vmul.f32 %v598_v48, %v2744_v11  ;;  %v615_v52 = vmul.f32 %v599_v30, %v2758_v38  ;;  %v1583_v0 = vrot.slane %v2273_v63, 1 }
 0x26f   :  { %v640_v10 = vrot.slane %v609_v41, 7  ;;  %v642_v19 = vrot.slane %v610_v13, 6  ;;  %v644_v59 = vrot.slane %v611_v36, 5  ;;  %v646_v35 = vrot.slane %v612_v56, 4 }
 0x270   :  { %v648_v44 = vrot.slane %v613_v5, 3  ;;  %v1584_v31 = vrot.slane %v2273_v63, 2  ;;  %v1585_v42 = vrot.slane %v2273_v63, 3  ;;  %v1586_v45 = vrot.slane %v2273_v63, 4 }
 0x271   :  { %v641_v9 = vsel %vm267_vm1, %v640_v10, %v608_v6  ;;  %v1587_v47 = vrot.slane %v2273_v63, 5  ;;  %v1588_v3 = vrot.slane %v2273_v63, 6  ;;  %v1589_v61 = vrot.slane %v2273_v63, 7 }
 0x272   :  { %v643_v62 = vsel %vm269_vm2, %v642_v19, %v641_v9  ;;  %v1613_v21 = vmul.f32 %v2273_v63, %v3099_v15  ;;  %v1614_v13 = vmul.f32 %v3102_v40, %v1583_v0  ;;  %v1615_v41 = vmul.f32 %v3104_v58, %v1584_v31  ;;  %v3935_v19 = vld [vmem:[#allocation14_spill] sm:$0xff] }
 0x273   :  { %v645_v53 = vsel %vm271_vm3, %v644_v59, %v643_v62  ;;  %v1616_v48 = vmul.f32 %v3108_v51, %v1585_v42  ;;  %v650_v36 = vrot.slane %v614_v50, 2  ;;  %v1617_v56 = vmul.f32 %v3112_v49, %v1586_v45  ;;  %v3936_v49 = vld [vmem:[#allocation11_spill] sm:$0xff]  ;;  %v3939_v42 = vld [vmem:[#allocation17_spill] sm:$0xff] }
 0x274   :  { %v647_v30 = vsel %vm273_vm4, %v646_v35, %v645_v53  ;;  %v1618_v6 = vmul.f32 %v3129_v20, %v1587_v47  ;;  %v652_v10 = vrot.slane %v615_v52, 1  ;;  %v1619_v15 = vmul.f32 %v3134_v39, %v1588_v3  ;;  %v3937_v20 = vld [vmem:[#allocation15_spill] sm:$0xff] }
 0x275   :  { %v649_v5 = vsel %vm275_vm5, %v648_v44, %v647_v30  ;;  %v1630_v63 = vmul.f32 %v1614_v13, %v2589_v43  ;;  %v1620_v58 = vmul.f32 %v3138_v28, %v1589_v61  ;;  %v1631_v51 = vmul.f32 %v1615_v41, %v2591_v46  ;;  %v3938_v44 = vld [vmem:[#allocation16_spill] sm:$0xff]  ;;  %v3940_v28 = vld [vmem:[#allocation18_spill] sm:$0xff] }
 0x276   :  { %v651_v40 = vsel %vm277_vm6, %v650_v36, %v649_v5  ;;  %v1632_v0 = vmul.f32 %v1616_v48, %v3935_v19  ;;  %v1629_v59 = vmul.f32 %v1613_v21, %v3936_v49  ;;  %v1633_v35 = vmul.f32 %v1617_v56, %v3937_v20 }
 0x277   :  { %v653_v50 = vsel %vm279_vm7, %v652_v10, %v651_v40  ;;  %v1634_v39 = vmul.f32 %v1618_v6, %v3938_v44  ;;  %v1661_v31 = vrot.slane %v1630_v63, 7  ;;  %v1663_v9 = vrot.slane %v1631_v51, 6 }
 0x278   :  { %v670_v52 = vsel %vm106_vm0, %v653_v50, 0.0  ;;  %v1635_v45 = vmul.f32 %v1619_v15, %v3939_v42  ;;  %v1636_v47 = vmul.f32 %v1620_v58, %v3940_v28  ;;  %v1665_v3 = vrot.slane %v1632_v0, 5 }
 0x279   :  { %671 = vadd.xlane.f32.xlu0 %v670_v52  ;;  %v1662_v62 = vsel %vm267_vm1, %v1661_v31, %v1629_v59  ;;  %v1667_v53 = vrot.slane %v1633_v35, 4  ;;  %v1669_v13 = vrot.slane %v1634_v39, 3 }
 0x27a   :  { %v1664_v61 = vsel %vm269_vm2, %v1663_v9, %v1662_v62  ;;  %v1671_v48 = vrot.slane %v1635_v45, 2  ;;  %v1673_v36 = vrot.slane %v1636_v47, 1 }
 0x27b   :  { %v1666_v21 = vsel %vm271_vm3, %v1665_v3, %v1664_v61 }
 0x27c   :  { %v1668_v41 = vsel %vm273_vm4, %v1667_v53, %v1666_v21 }
 0x27d   :  { %v1670_v30 = vsel %vm275_vm5, %v1669_v13, %v1668_v41 }
 0x27e   :  { %v1672_v56 = vsel %vm277_vm6, %v1671_v48, %v1670_v30 }
 0x27f   :  { %v1674_v6 = vsel %vm279_vm7, %v1673_v36, %v1672_v56  ;;  %v3946_v56 = vld [vmem:[#allocation33_spill] sm:$0xff] }
 0x280   :  { %v1691_v5 = vsel %vm106_vm0, %v1674_v6, 0.0 }
 0x281   :  { %1692 = vadd.xlane.f32.xlu0 %v1691_v5 }
 0x28d   :  { %v557_v10 = vpop.xlane.xlu1 %556 }
 0x28e   :  { %2274 = vrcp.f32 %v557_v10 }
 0x291   :  { %v1578_v15 = vpop.xlane.xlu1 %1577 }
 0x292   :  { %2276 = vrcp.f32 %v1578_v15 }
 0x298   :  { %v2275_v63 = vpop.eup %2274 }
 0x299   :  { %v569_v40 = vrot.slane %v2275_v63, 1  ;;  %v570_v58 = vrot.slane %v2275_v63, 2  ;;  %v571_v51 = vrot.slane %v2275_v63, 3  ;;  %v572_v0 = vrot.slane %v2275_v63, 4 }
 0x29a   :  { %v573_v50 = vrot.slane %v2275_v63, 5  ;;  %v574_v59 = vrot.slane %v2275_v63, 6  ;;  %v575_v35 = vrot.slane %v2275_v63, 7  ;;  %v600_v52 = vmul.f32 %v2275_v63, %v3164_v37  ;;  %v3941_v37 = vld [vmem:[#allocation29_spill] sm:$0xff] }
 0x29b   :  { %v601_v39 = vmul.f32 %v3166_v22, %v569_v40  ;;  %v602_v31 = vmul.f32 %v3168_v26, %v570_v58  ;;  %v603_v9 = vmul.f32 %v3171_v32, %v571_v51  ;;  %v604_v45 = vmul.f32 %v3176_v27, %v572_v0  ;;  %v3942_v22 = vld [vmem:[#allocation30_spill] sm:$0xff]  ;;  %v3943_v26 = vld [vmem:[#allocation27_spill] sm:$0xff]  ;;  %v3945_v27 = vld [vmem:[#allocation32_spill] sm:$0xff] }
 0x29c   :  { %v2277_v47 = vpop.eup %2276  ;;  %v605_v62 = vmul.f32 %v3197_v12, %v573_v50  ;;  %v606_v3 = vmul.f32 %v3201_v25, %v574_v59  ;;  %v607_v61 = vmul.f32 %v3206_v60, %v575_v35  ;;  %v616_v48 = vmul.f32 %v600_v52, %v3943_v26  ;;  %v3944_v32 = vld [vmem:[#allocation31_spill] sm:$0xff] }
 0x29d   :  { %v617_v53 = vmul.f32 %v601_v39, %v2863_v55  ;;  %v618_v21 = vmul.f32 %v602_v31, %v2865_v14  ;;  %v619_v13 = vmul.f32 %v603_v9, %v3941_v37  ;;  %v620_v41 = vmul.f32 %v604_v45, %v3942_v22 }
 0x29e   :  { %v621_v30 = vmul.f32 %v605_v62, %v3944_v32  ;;  %v622_v36 = vmul.f32 %v606_v3, %v3945_v27  ;;  %v623_v12 = vmul.f32 %v607_v61, %v3946_v56  ;;  %v1590_v5 = vrot.slane %v2277_v47, 1 }
 0x29f   :  { %v654_v6 = vrot.slane %v617_v53, 7  ;;  %v656_v25 = vrot.slane %v618_v21, 6  ;;  %v658_v60 = vrot.slane %v619_v13, 5  ;;  %v660_v10 = vrot.slane %v620_v41, 4 }
 0x2a0   :  { %v662_v15 = vrot.slane %v621_v30, 3  ;;  %v1591_v63 = vrot.slane %v2277_v47, 2  ;;  %v1592_v58 = vrot.slane %v2277_v47, 3  ;;  %v1593_v51 = vrot.slane %v2277_v47, 4  ;;  %v3949_v30 = vld [vmem:[#allocation22_spill] sm:$0xff] }
 0x2a1   :  { %v655_v40 = vsel %vm267_vm1, %v654_v6, %v616_v48  ;;  %v1594_v0 = vrot.slane %v2277_v47, 5  ;;  %v1595_v59 = vrot.slane %v2277_v47, 6  ;;  %v1596_v35 = vrot.slane %v2277_v47, 7  ;;  %v3948_v48 = vld [vmem:[#allocation21_spill] sm:$0xff] }
 0x2a2   :  { %v657_v50 = vsel %vm269_vm2, %v656_v25, %v655_v40  ;;  %v1621_v52 = vmul.f32 %v2277_v47, %v3179_v7  ;;  %v1622_v31 = vmul.f32 %v3182_v57, %v1590_v5  ;;  %v1623_v9 = vmul.f32 %v3184_v24, %v1591_v63  ;;  %v3947_v47 = vld [vmem:[#allocation20_spill] sm:$0xff]  ;;  %v3953_v63 = vld [vmem:[#allocation25_spill] sm:$0xff] }
 0x2a3   :  { %v659_v39 = vsel %vm271_vm3, %v658_v60, %v657_v50  ;;  %v1624_v45 = vmul.f32 %v3188_v1, %v1592_v58  ;;  %v664_v3 = vrot.slane %v622_v36, 2  ;;  %v1625_v61 = vmul.f32 %v3192_v18, %v1593_v51  ;;  %v3950_v18 = vld [vmem:[#allocation19_spill] sm:$0xff]  ;;  %v3952_v60 = vld [vmem:[#allocation24_spill] sm:$0xff] }
 0x2a4   :  { %v661_v62 = vsel %vm273_vm4, %v660_v10, %v659_v39  ;;  %v1626_v53 = vmul.f32 %v3209_v16, %v1594_v0  ;;  %v666_v13 = vrot.slane %v623_v12, 1  ;;  %v1627_v7 = vmul.f32 %v3214_v4, %v1595_v59  ;;  %v3951_v16 = vld [vmem:[#allocation23_spill] sm:$0xff] }
 0x2a5   :  { %v663_v21 = vsel %vm275_vm5, %v662_v15, %v661_v62  ;;  %v1638_v41 = vmul.f32 %v1622_v31, %v3947_v47  ;;  %v1628_v24 = vmul.f32 %v3218_v23, %v1596_v35  ;;  %v1639_v1 = vmul.f32 %v1623_v9, %v3948_v48  ;;  %v3954_v23 = vld [vmem:[#allocation26_spill] sm:$0xff] }
 0x2a6   :  { %v665_v57 = vsel %vm277_vm6, %v664_v3, %v663_v21  ;;  %v1640_v6 = vmul.f32 %v1624_v45, %v3949_v30  ;;  %v1637_v25 = vmul.f32 %v1621_v52, %v3950_v18  ;;  %v1641_v5 = vmul.f32 %v1625_v61, %v3951_v16 }
 0x2a7   :  { %v667_v36 = vsel %vm279_vm7, %v666_v13, %v665_v57  ;;  %v1642_v4 = vmul.f32 %v1626_v53, %v3952_v60  ;;  %v1675_v10 = vrot.slane %v1638_v41, 7  ;;  %v1677_v15 = vrot.slane %v1639_v1, 6 }
 0x2a8   :  { %v673_v12 = vsel %vm106_vm0, %v667_v36, 0.0  ;;  %v1643_v40 = vmul.f32 %v1627_v7, %v3953_v63  ;;  %v1644_v58 = vmul.f32 %v1628_v24, %v3954_v23  ;;  %v1679_v0 = vrot.slane %v1640_v6, 5 }
 0x2a9   :  { %674 = vadd.xlane.f32.xlu1 %v673_v12  ;;  %v1676_v51 = vsel %vm267_vm1, %v1675_v10, %v1637_v25  ;;  %v1681_v59 = vrot.slane %v1641_v5, 4  ;;  %v1683_v52 = vrot.slane %v1642_v4, 3 }
 0x2aa   :  { %v1678_v50 = vsel %vm269_vm2, %v1677_v15, %v1676_v51  ;;  %v1685_v31 = vrot.slane %v1643_v40, 2  ;;  %v1687_v45 = vrot.slane %v1644_v58, 1 }
 0x2ab   :  { %v1680_v35 = vsel %vm271_vm3, %v1679_v0, %v1678_v50 }
 0x2ac   :  { %v1682_v39 = vsel %vm273_vm4, %v1681_v59, %v1680_v35 }
 0x2ad   :  { %v1684_v9 = vsel %vm275_vm5, %v1683_v52, %v1682_v39 }
 0x2ae   :  { %v1686_v62 = vsel %vm277_vm6, %v1685_v31, %v1684_v9 }
 0x2af   :  { %v1688_v3 = vsel %vm279_vm7, %v1687_v45, %v1686_v62 }
 0x2b0   :  { %v1694_v61 = vsel %vm106_vm0, %v1688_v3, 0.0 }
 0x2b1   :  { %1695 = vadd.xlane.f32.xlu1 %v1694_v61 }
 0x306   :  { %v672_v53 = vpop.xlane.xlu0 %671 }
 0x307   :  { %v676_v21 = vmul.f32 %v672_v53, %v672_v53 }
 0x309   :  { %v678_v13 = vrot.slane %v676_v21, 4 }
 0x30b   :  { %v679_v7 = vadd.f32 %v678_v13, %v676_v21 }
 0x30d   :  { %v680_v41 = vrot.slane %v679_v7, 2 }
 0x30e   :  { %v1693_v24 = vpop.xlane.xlu0 %1692 }
 0x30f   :  { %v681_v57 = vadd.f32 %v680_v41, %v679_v7  ;;  %v1697_v1 = vmul.f32 %v1693_v24, %v1693_v24 }
 0x311   :  { %v682_v6 = vrot.slane %v681_v57, 1  ;;  %v1699_v36 = vrot.slane %v1697_v1, 4 }
 0x313   :  { %v683_v25 = vadd.f32 %v682_v6, %v681_v57  ;;  %v1700_v5 = vadd.f32 %v1699_v36, %v1697_v1 }
 0x315   :  { %v690_v12 = vadd.f32 1e-12, %v683_v25  ;;  %v696_v4 = vadd.f32 1.0, %v683_v25  ;;  %v1701_v10 = vrot.slane %v1700_v5, 2 }
 0x317   :  { %2278 = vrsqrt.f32 %v690_v12  ;;  %v1702_v15 = vadd.f32 %v1701_v10, %v1700_v5 }
 0x318   :  { %2280 = vrcp.f32 %v696_v4  ;;  %v3955_v4 = vld [vmem:[#allocation40_spill] sm:$0xff] }
 0x319   :  { %v1703_v40 = vrot.slane %v1702_v15, 1 }
 0x31b   :  { %v1704_v58 = vadd.f32 %v1703_v40, %v1702_v15  ;;  %v3956_v15 = vld [vmem:[#allocation41_spill] sm:$0xff] }
 0x31d   :  { %v1711_v51 = vadd.f32 1e-12, %v1704_v58  ;;  %v1717_v0 = vadd.f32 1.0, %v1704_v58 }
 0x31f   :  { %2282 = vrsqrt.f32 %v1711_v51  ;;  %v3957_v51 = vld [vmem:[#allocation42_spill] sm:$0xff] }
 0x320   :  { %2284 = vrcp.f32 %v1717_v0 }
 0x321   :  { %v2279_v50 = vpop.eup %2278 }
 0x322   :  { %v694_v59 = vmul.f32 %v2279_v50, %v683_v25  ;;  %v2281_v35 = vpop.eup %2280 }
 0x324   :  { %v700_v52 = vmul.f32 %v2281_v35, %v694_v59  ;;  %v3958_v59 = vld [vmem:[#allocation43_spill] sm:$0xff] }
 0x326   :  { %v702_v39 = vmul.f32 %v700_v52, %v672_v53 }
 0x328   :  { %v706_v31 = vrot.slane %v702_v39, 1  ;;  %v707_v9 = vrot.slane %v702_v39, 2  ;;  %v708_v45 = vrot.slane %v702_v39, 3  ;;  %v709_v62 = vrot.slane %v702_v39, 4 }
 0x329   :  { %v710_v3 = vrot.slane %v702_v39, 5  ;;  %v711_v61 = vrot.slane %v702_v39, 6  ;;  %v712_v21 = vrot.slane %v702_v39, 7  ;;  %v736_v13 = vmul.f32 %v702_v39, %v2671_v8  ;;  %v2283_v7 = vpop.eup %2282  ;;  %v3960_v39 = vld [vmem:[#allocation47_spill] sm:$0xff] }
 0x32a   :  { %v737_v41 = vmul.f32 %v706_v31, %v2673_v29  ;;  %v738_v57 = vmul.f32 %v707_v9, %v2679_v17  ;;  %v739_v1 = vmul.f32 %v708_v45, %v2681_v34  ;;  %v740_v6 = vmul.f32 %v709_v62, %v2694_v33  ;;  %v2285_v12 = vpop.eup %2284  ;;  %v3961_v9 = vld [vmem:[#allocation45_spill] sm:$0xff]  ;;  %v3962_v62 = vld [vmem:[#allocation48_spill] sm:$0xff] }
 0x32b   :  { %v1715_v36 = vmul.f32 %v2283_v7, %v1704_v58  ;;  %v741_v53 = vmul.f32 %v710_v3, %v2726_v2  ;;  %v742_v25 = vmul.f32 %v711_v61, %v2744_v11  ;;  %v743_v5 = vmul.f32 %v712_v21, %v2758_v38  ;;  %v3959_v58 = vld [vmem:[#allocation46_spill] sm:$0xff] }
 0x32c   :  { %v3333_v10 = vadd.f32 %v737_v41, %v3955_v4  ;;  %v3336_v40 = vadd.f32 %v738_v57, %v3956_v15  ;;  %v3339_v0 = vadd.f32 %v739_v1, %v3957_v51  ;;  %v3342_v35 = vadd.f32 %v740_v6, %v3958_v59 }
 0x32d   :  { %v1721_v50 = vmul.f32 %v2285_v12, %v1715_v36  ;;  %v3345_v52 = vadd.f32 %v741_v53, %v3959_v58  ;;  %v3348_v31 = vadd.f32 %v742_v25, %v3960_v39  ;;  %v3351_v45 = vadd.f32 %v736_v13, %v3961_v9 }
 0x32e   :  { %v3354_v3 = vadd.f32 %v743_v5, %v3962_v62  ;;  %v784_v61 = vrot.slane %v3333_v10, 7  ;;  %v786_v21 = vrot.slane %v3336_v40, 6  ;;  %v788_v41 = vrot.slane %v3339_v0, 5 }
 0x32f   :  { %v1723_v7 = vmul.f32 %v1721_v50, %v1693_v24  ;;  %v790_v57 = vrot.slane %v3342_v35, 4  ;;  %v792_v6 = vrot.slane %v3345_v52, 3  ;;  %v794_v13 = vrot.slane %v3348_v31, 2 }
 0x330   :  { %v785_v1 = vsel %vm267_vm1, %v784_v61, %v3351_v45  ;;  %v796_v36 = vrot.slane %v3354_v3, 1 }
 0x331   :  { %v787_v53 = vsel %vm269_vm2, %v786_v21, %v785_v1  ;;  %v1727_v25 = vrot.slane %v1723_v7, 1  ;;  %v1728_v5 = vrot.slane %v1723_v7, 2  ;;  %v1729_v12 = vrot.slane %v1723_v7, 3 }
 0x332   :  { %v789_v24 = vsel %vm271_vm3, %v788_v41, %v787_v53  ;;  %v1730_v4 = vrot.slane %v1723_v7, 4  ;;  %v1731_v15 = vrot.slane %v1723_v7, 5  ;;  %v1732_v51 = vrot.slane %v1723_v7, 6 }
 0x333   :  { %v791_v50 = vsel %vm273_vm4, %v790_v57, %v789_v24  ;;  %v1733_v59 = vrot.slane %v1723_v7, 7  ;;  %v1757_v58 = vmul.f32 %v1723_v7, %v3936_v49  ;;  %v1758_v39 = vmul.f32 %v1727_v25, %v2589_v43  ;;  %v3963_v25 = vld [vmem:[#allocation34_spill] sm:$0xff] }
 0x334   :  { %v793_v9 = vsel %vm275_vm5, %v792_v6, %v791_v50  ;;  %v1759_v62 = vmul.f32 %v1728_v5, %v2591_v46  ;;  %v1760_v61 = vmul.f32 %v1729_v12, %v3935_v19  ;;  %v1761_v21 = vmul.f32 %v1730_v4, %v3937_v20  ;;  %v3964_v6 = vld [vmem:[#allocation35_spill] sm:$0xff]  ;;  %v3965_v50 = vld [vmem:[#allocation37_spill] sm:$0xff] }
 0x335   :  { %v795_v41 = vsel %vm277_vm6, %v794_v13, %v793_v9  ;;  %v1762_v1 = vmul.f32 %v1731_v15, %v3938_v44  ;;  %v1763_v53 = vmul.f32 %v1732_v51, %v3939_v42  ;;  %v1764_v7 = vmul.f32 %v1733_v59, %v3940_v28  ;;  %v3966_v15 = vld [vmem:[#allocation38_spill] sm:$0xff]  ;;  %v3967_v51 = vld [vmem:[#allocation36_spill] sm:$0xff]  ;;  %v3968_v59 = vld [vmem:[#allocation39_spill] sm:$0xff] }
 0x336   :  { %v675_v57 = vpop.xlane.xlu1 %674  ;;  %v797_v24 = vsel %vm279_vm7, %v796_v36, %v795_v41  ;;  %v3380_v49 = vadd.f32 %v1758_v39, %v3963_v25  ;;  %v3383_v5 = vadd.f32 %v1759_v62, %v3964_v6  ;;  %v3387_v13 = vadd.f32 %v1760_v61, %v3965_v50  ;;  %v3969_v25 = vld [vmem:[#allocation44_spill] sm:$0xff]  ;;  %v3970_v61 = vld [vmem:[#allocation49_spill] sm:$0xff] }
 0x337   :  { %v677_v12 = vmul.f32 %v675_v57, %v675_v57  ;;  %v814_v4 = vsel %vm106_vm0, %v797_v24, -inf  ;;  %v3390_v9 = vadd.f32 %v1761_v21, %v3966_v15  ;;  %v3393_v36 = vadd.f32 %v1757_v58, %v3967_v51 }
 0x338   :  { %815 = vmax.xlane.f32.xlu0 %v814_v4  ;;  %v3396_v41 = vadd.f32 %v1762_v1, %v3968_v59  ;;  %v1805_v39 = vrot.slane %v3380_v49, 7  ;;  %v3400_v6 = vadd.f32 %v1763_v53, %v3969_v25  ;;  %v1807_v24 = vrot.slane %v3383_v5, 6 }
 0x339   :  { %v684_v62 = vrot.slane %v677_v12, 4  ;;  %v3404_v50 = vadd.f32 %v1764_v7, %v3970_v61  ;;  %v1809_v58 = vrot.slane %v3387_v13, 5  ;;  %v1811_v15 = vrot.slane %v3390_v9, 4 }
 0x33a   :  { %v1806_v21 = vsel %vm267_vm1, %v1805_v39, %v3393_v36  ;;  %v1813_v53 = vrot.slane %v3396_v41, 3  ;;  %v1815_v7 = vrot.slane %v3400_v6, 2 }
 0x33b   :  { %v685_v4 = vadd.f32 %v684_v62, %v677_v12  ;;  %v1808_v1 = vsel %vm269_vm2, %v1807_v24, %v1806_v21  ;;  %v1817_v39 = vrot.slane %v3404_v50, 1 }
 0x33c   :  { %v1810_v51 = vsel %vm271_vm3, %v1809_v58, %v1808_v1 }
 0x33d   :  { %v686_v59 = vrot.slane %v685_v4, 2  ;;  %v1812_v25 = vsel %vm273_vm4, %v1811_v15, %v1810_v51 }
 0x33e   :  { %v1814_v61 = vsel %vm275_vm5, %v1813_v53, %v1812_v25  ;;  %v1696_v42 = vpop.xlane.xlu1 %1695 }
 0x33f   :  { %v687_v28 = vadd.f32 %v686_v59, %v685_v4  ;;  %v1816_v12 = vsel %vm277_vm6, %v1815_v7, %v1814_v61  ;;  %v1698_v62 = vmul.f32 %v1696_v42, %v1696_v42 }
 0x340   :  { %v1818_v24 = vsel %vm279_vm7, %v1817_v39, %v1816_v12 }
 0x341   :  { %v688_v21 = vrot.slane %v687_v28, 1  ;;  %v1835_v58 = vsel %vm106_vm0, %v1818_v24, -inf  ;;  %v1705_v1 = vrot.slane %v1698_v62, 4 }
 0x342   :  { %1836 = vmax.xlane.f32.xlu0 %v1835_v58 }
 0x343   :  { %v689_v44 = vadd.f32 %v688_v21, %v687_v28  ;;  %v1706_v15 = vadd.f32 %v1705_v1, %v1698_v62 }
 0x345   :  { %v691_v51 = vadd.f32 1e-12, %v689_v44  ;;  %v697_v20 = vadd.f32 1.0, %v689_v44  ;;  %v1707_v19 = vrot.slane %v1706_v15, 2 }
 0x347   :  { %2286 = vrsqrt.f32 %v691_v51  ;;  %v1708_v53 = vadd.f32 %v1707_v19, %v1706_v15 }
 0x348   :  { %2288 = vrcp.f32 %v697_v20 }
 0x349   :  { %v1709_v4 = vrot.slane %v1708_v53, 1 }
 0x34b   :  { %v1710_v59 = vadd.f32 %v1709_v4, %v1708_v53 }
 0x34d   :  { %v1712_v25 = vadd.f32 1e-12, %v1710_v59  ;;  %v1718_v7 = vadd.f32 1.0, %v1710_v59 }
 0x34f   :  { %2290 = vrsqrt.f32 %v1712_v25 }
 0x350   :  { %2292 = vrcp.f32 %v1718_v7 }
 0x351   :  { %v2287_v61 = vpop.eup %2286 }
 0x352   :  { %v695_v39 = vmul.f32 %v2287_v61, %v689_v44  ;;  %v2289_v12 = vpop.eup %2288 }
 0x354   :  { %v701_v24 = vmul.f32 %v2289_v12, %v695_v39 }
 0x356   :  { %v703_v46 = vmul.f32 %v701_v24, %v675_v57 }
 0x358   :  { %v713_v58 = vrot.slane %v703_v46, 1  ;;  %v714_v28 = vrot.slane %v703_v46, 2  ;;  %v715_v62 = vrot.slane %v703_v46, 3  ;;  %v716_v21 = vrot.slane %v703_v46, 4 }
 0x359   :  { %v717_v1 = vrot.slane %v703_v46, 5  ;;  %v718_v43 = vrot.slane %v703_v46, 6  ;;  %v719_v51 = vrot.slane %v703_v46, 7  ;;  %v744_v19 = vmul.f32 %v703_v46, %v3943_v26  ;;  %v2291_v20 = vpop.eup %2290  ;;  %v3971_v46 = vld [vmem:[#allocation56_spill] sm:$0xff]  ;;  %v3973_v26 = vld [vmem:[#allocation58_spill] sm:$0xff] }
 0x35a   :  { %v745_v15 = vmul.f32 %v713_v58, %v2863_v55  ;;  %v746_v53 = vmul.f32 %v714_v28, %v2865_v14  ;;  %v747_v44 = vmul.f32 %v715_v62, %v3941_v37  ;;  %v748_v4 = vmul.f32 %v716_v21, %v3942_v22  ;;  %v2293_v39 = vpop.eup %2292  ;;  %v3972_v58 = vld [vmem:[#allocation57_spill] sm:$0xff] }
 0x35b   :  { %v1716_v25 = vmul.f32 %v2291_v20, %v1710_v59  ;;  %v749_v57 = vmul.f32 %v717_v1, %v3944_v32  ;;  %v750_v7 = vmul.f32 %v718_v43, %v3945_v27  ;;  %v751_v61 = vmul.f32 %v719_v51, %v3946_v56  ;;  %v3974_v59 = vld [vmem:[#allocation60_spill] sm:$0xff]  ;;  %v3975_v43 = vld [vmem:[#allocation61_spill] sm:$0xff]  ;;  %v3976_v51 = vld [vmem:[#allocation59_spill] sm:$0xff] }
 0x35c   :  { %v3429_v12 = vadd.f32 %v745_v15, %v3014_v54  ;;  %v3432_v24 = vadd.f32 %v746_v53, %v3971_v46  ;;  %v3435_v28 = vadd.f32 %v747_v44, %v3972_v58  ;;  %v3438_v21 = vadd.f32 %v748_v4, %v3973_v26  ;;  %v3977_v54 = vld [vmem:[#allocation63_spill] sm:$0xff] }
 0x35d   :  { %v1722_v62 = vmul.f32 %v2293_v39, %v1716_v25  ;;  %v3441_v1 = vadd.f32 %v749_v57, %v3974_v59  ;;  %v3444_v20 = vadd.f32 %v750_v7, %v3975_v43  ;;  %v3447_v56 = vadd.f32 %v744_v19, %v3976_v51 }
 0x35e   :  { %v3450_v15 = vadd.f32 %v751_v61, %v3977_v54  ;;  %v798_v53 = vrot.slane %v3429_v12, 7  ;;  %v800_v44 = vrot.slane %v3432_v24, 6  ;;  %v802_v26 = vrot.slane %v3435_v28, 5 }
 0x35f   :  { %v1724_v25 = vmul.f32 %v1722_v62, %v1696_v42  ;;  %v804_v4 = vrot.slane %v3438_v21, 4  ;;  %v806_v7 = vrot.slane %v3441_v1, 3  ;;  %v808_v19 = vrot.slane %v3444_v20, 2 }
 0x360   :  { %v799_v57 = vsel %vm267_vm1, %v798_v53, %v3447_v56  ;;  %v810_v39 = vrot.slane %v3450_v15, 1 }
 0x361   :  { %v801_v61 = vsel %vm269_vm2, %v800_v44, %v799_v57  ;;  %v1734_v46 = vrot.slane %v1724_v25, 1  ;;  %v1735_v58 = vrot.slane %v1724_v25, 2  ;;  %v1736_v59 = vrot.slane %v1724_v25, 3 }
 0x362   :  { %v803_v42 = vsel %vm271_vm3, %v802_v26, %v801_v61  ;;  %v1737_v62 = vrot.slane %v1724_v25, 4  ;;  %v1738_v43 = vrot.slane %v1724_v25, 5  ;;  %v1739_v51 = vrot.slane %v1724_v25, 6 }
 0x363   :  { %v805_v54 = vsel %vm273_vm4, %v804_v4, %v803_v42  ;;  %v1740_v27 = vrot.slane %v1724_v25, 7  ;;  %v1765_v53 = vmul.f32 %v1724_v25, %v3950_v18  ;;  %v1766_v32 = vmul.f32 %v1734_v46, %v3947_v47  ;;  %v3978_v42 = vld [vmem:[#allocation50_spill] sm:$0xff] }
 0x364   :  { %v807_v22 = vsel %vm275_vm5, %v806_v7, %v805_v54  ;;  %v1767_v37 = vmul.f32 %v1735_v58, %v3948_v48  ;;  %v1768_v44 = vmul.f32 %v1736_v59, %v3949_v30  ;;  %v1769_v57 = vmul.f32 %v1737_v62, %v3951_v16  ;;  %v3979_v7 = vld [vmem:[#allocation51_spill] sm:$0xff]  ;;  %v3980_v59 = vld [vmem:[#allocation53_spill] sm:$0xff] }
 0x365   :  { %v809_v26 = vsel %vm277_vm6, %v808_v19, %v807_v22  ;;  %v1770_v61 = vmul.f32 %v1738_v43, %v3952_v60  ;;  %v1771_v14 = vmul.f32 %v1739_v51, %v3953_v63  ;;  %v1772_v25 = vmul.f32 %v1740_v27, %v3954_v23  ;;  %v3981_v22 = vld [vmem:[#allocation54_spill] sm:$0xff]  ;;  %v3982_v43 = vld [vmem:[#allocation52_spill] sm:$0xff] }
 0x366   :  { %v811_v4 = vsel %vm279_vm7, %v810_v39, %v809_v26  ;;  %v3476_v46 = vadd.f32 %v1766_v32, %v3978_v42  ;;  %v3479_v54 = vadd.f32 %v1767_v37, %v3979_v7  ;;  %v3483_v62 = vadd.f32 %v1768_v44, %v3980_v59  ;;  %v3983_v39 = vld [vmem:[#allocation55_spill] sm:$0xff]  ;;  %v3984_v26 = vld [vmem:[#allocation62_spill] sm:$0xff] }
 0x367   :  { %v817_v58 = vsel %vm106_vm0, %v811_v4, -inf  ;;  %v3486_v19 = vadd.f32 %v1769_v57, %v3981_v22  ;;  %v3489_v51 = vadd.f32 %v1765_v53, %v3982_v43  ;;  %v3492_v27 = vadd.f32 %v1770_v61, %v3983_v39  ;;  %v3985_v4 = vld [vmem:[#allocation64_spill] sm:$0xff] }
 0x368   :  { %818 = vmax.xlane.f32.xlu1 %v817_v58  ;;  %v1819_v32 = vrot.slane %v3476_v46, 7  ;;  %v1821_v37 = vrot.slane %v3479_v54, 6  ;;  %v3497_v42 = vadd.f32 %v1771_v14, %v3984_v26  ;;  %v3500_v44 = vadd.f32 %v1772_v25, %v3985_v4 }
 0x369   :  { %v1823_v7 = vrot.slane %v3483_v62, 5  ;;  %v1825_v61 = vrot.slane %v3486_v19, 4  ;;  %v1827_v59 = vrot.slane %v3492_v27, 3 }
 0x36a   :  { %v1820_v57 = vsel %vm267_vm1, %v1819_v32, %v3489_v51  ;;  %v1829_v14 = vrot.slane %v3497_v42, 2  ;;  %v1831_v43 = vrot.slane %v3500_v44, 1 }
 0x36b   :  { %v1822_v53 = vsel %vm269_vm2, %v1821_v37, %v1820_v57 }
 0x36c   :  { %v1824_v58 = vsel %vm271_vm3, %v1823_v7, %v1822_v53 }
 0x36d   :  { %v1826_v22 = vsel %vm273_vm4, %v1825_v61, %v1824_v58 }
 0x36e   :  { %v1828_v25 = vsel %vm275_vm5, %v1827_v59, %v1826_v22 }
 0x36f   :  { %v1830_v39 = vsel %vm277_vm6, %v1829_v14, %v1828_v25 }
 0x370   :  { %v1832_v32 = vsel %vm279_vm7, %v1831_v43, %v1830_v39 }
 0x371   :  { %v1838_v37 = vsel %vm106_vm0, %v1832_v32, -inf }
 0x372   :  { %1839 = vmax.xlane.f32.xlu1 %v1838_v37 }
 0x3c5   :  { %v816_v26 = vpop.xlane.xlu0 %815 }
 0x3c6   :  { %v822_v4 = vrot.slane %v816_v26, 1  ;;  %v823_v57 = vrot.slane %v816_v26, 2  ;;  %v824_v7 = vrot.slane %v816_v26, 3  ;;  %v825_v53 = vrot.slane %v816_v26, 4 }
 0x3c7   :  { %v826_v23 = vrot.slane %v816_v26, 5  ;;  %v827_v61 = vrot.slane %v816_v26, 6  ;;  %v852_v58 = vsub.f32 %v3351_v45, %v816_v26  ;;  %v828_v43 = vrot.slane %v816_v26, 7 }
 0x3c8   :  { %v853_v59 = vsub.f32 %v3333_v10, %v822_v4  ;;  %v854_v22 = vsub.f32 %v3336_v40, %v823_v57  ;;  %v855_v14 = vsub.f32 %v3339_v0, %v824_v7  ;;  %v856_v25 = vsub.f32 %v3342_v35, %v825_v53 }
 0x3c9   :  { %v868_v39 = vmul.f32 1.442695, %v852_v58  ;;  %v857_v60 = vsub.f32 %v3345_v52, %v826_v23  ;;  %v858_v18 = vsub.f32 %v3348_v31, %v827_v61  ;;  %v859_v40 = vsub.f32 %v3354_v3, %v828_v43 }
 0x3ca   :  { %v870_v32 = vmul.f32 1.442695, %v853_v59  ;;  %v872_v37 = vmul.f32 1.442695, %v854_v22  ;;  %v874_v63 = vmul.f32 1.442695, %v855_v14 }
 0x3cb   :  { %2294 = vpow2.f32 %v868_v39  ;;  %v876_v16 = vmul.f32 1.442695, %v856_v25  ;;  %v878_v0 = vmul.f32 1.442695, %v857_v60  ;;  %v880_v35 = vmul.f32 1.442695, %v858_v18 }
 0x3cc   :  { %2296 = vpow2.f32 %v870_v32 }
 0x3cd   :  { %2298 = vpow2.f32 %v872_v37 }
 0x3ce   :  { %2300 = vpow2.f32 %v874_v63 }
 0x3cf   :  { %2302 = vpow2.f32 %v876_v16  ;;  %v1837_v10 = vpop.xlane.xlu0 %1836 }
 0x3d0   :  { %v1843_v45 = vrot.slane %v1837_v10, 1  ;;  %v1844_v26 = vrot.slane %v1837_v10, 2  ;;  %v1845_v4 = vrot.slane %v1837_v10, 3  ;;  %v1846_v57 = vrot.slane %v1837_v10, 4 }
 0x3d1   :  { %v1847_v7 = vrot.slane %v1837_v10, 5  ;;  %v1848_v53 = vrot.slane %v1837_v10, 6  ;;  %v1849_v23 = vrot.slane %v1837_v10, 7  ;;  %v1873_v52 = vsub.f32 %v3393_v36, %v1837_v10 }
 0x3d2   :  { %v1874_v31 = vsub.f32 %v3380_v49, %v1843_v45  ;;  %v1875_v61 = vsub.f32 %v3383_v5, %v1844_v26  ;;  %v1876_v16 = vsub.f32 %v3387_v13, %v1845_v4  ;;  %v1877_v63 = vsub.f32 %v3390_v9, %v1846_v57 }
 0x3d3   :  { %v1878_v60 = vsub.f32 %v3396_v41, %v1847_v7  ;;  %v1889_v18 = vmul.f32 1.442695, %v1873_v52  ;;  %2304 = vpow2.f32 %v878_v0  ;;  %v1879_v3 = vsub.f32 %v3400_v6, %v1848_v53 }
 0x3d4   :  { %v1891_v58 = vmul.f32 1.442695, %v1874_v31  ;;  %v1893_v59 = vmul.f32 1.442695, %v1875_v61  ;;  %v1895_v22 = vmul.f32 1.442695, %v1876_v16  ;;  %2306 = vpow2.f32 %v880_v35 }
 0x3d5   :  { %v3531_v14 = vpop.eup %2294  ;;  %2308 = vpow2.f32 %v1889_v18  ;;  %v1897_v49 = vmul.f32 1.442695, %v1877_v63  ;;  %v1880_v5 = vsub.f32 %v3404_v50, %v1849_v23  ;;  %v882_v13 = vmul.f32 1.442695, %v859_v40 }
 0x3d6   :  { %v3534_v36 = vpop.eup %2296  ;;  %2310 = vpow2.f32 %v1891_v58  ;;  %v1899_v6 = vmul.f32 1.442695, %v1878_v60  ;;  %v1901_v39 = vmul.f32 1.442695, %v1879_v3 }
 0x3d7   :  { %v3536_v9 = vpop.eup %2298  ;;  %2312 = vpow2.f32 %v1893_v59  ;;  %v916_v41 = vrot.slane %v3534_v36, 7  ;;  %v1903_v10 = vmul.f32 1.442695, %v1880_v5 }
 0x3d8   :  { %v3539_v25 = vpop.eup %2300  ;;  %2314 = vpow2.f32 %v1895_v22  ;;  %v918_v43 = vrot.slane %v3536_v9, 6 }
 0x3d9   :  { %v3542_v32 = vpop.eup %2302  ;;  %2316 = vpow2.f32 %v1897_v49  ;;  %v917_v50 = vsel %vm267_vm1, %v916_v41, %v3531_v14  ;;  %v920_v37 = vrot.slane %v3539_v25, 5 }
 0x3da   :  { %2318 = vpow2.f32 %v882_v13  ;;  %v919_v40 = vsel %vm269_vm2, %v918_v43, %v917_v50  ;;  %v922_v35 = vrot.slane %v3542_v32, 4 }
 0x3db   :  { %v921_v0 = vsel %vm271_vm3, %v920_v37, %v919_v40  ;;  %2320 = vpow2.f32 %v1899_v6 }
 0x3dc   :  { %2322 = vpow2.f32 %v1901_v39  ;;  %v923_v4 = vsel %vm273_vm4, %v922_v35, %v921_v0 }
 0x3dd   :  { %v3550_v45 = vpop.eup %2304  ;;  %2324 = vpow2.f32 %v1903_v10 }
 0x3de   :  { %v3552_v26 = vpop.eup %2306  ;;  %v924_v7 = vrot.slane %v3550_v45, 3 }
 0x3df   :  { %v3555_v57 = vpop.eup %2308  ;;  %v926_v16 = vrot.slane %v3552_v26, 2 }
 0x3e0   :  { %v3558_v53 = vpop.eup %2310  ;;  %v925_v52 = vsel %vm275_vm5, %v924_v7, %v923_v4 }
 0x3e1   :  { %v3560_v23 = vpop.eup %2312  ;;  %v1937_v31 = vrot.slane %v3558_v53, 7  ;;  %v927_v59 = vsel %vm277_vm6, %v926_v16, %v925_v52 }
 0x3e2   :  { %v3564_v61 = vpop.eup %2314  ;;  %v1939_v63 = vrot.slane %v3560_v23, 6 }
 0x3e3   :  { %v3568_v60 = vpop.eup %2316  ;;  %v1938_v18 = vsel %vm267_vm1, %v1937_v31, %v3555_v57  ;;  %v1941_v3 = vrot.slane %v3564_v61, 5 }
 0x3e4   :  { %v3573_v58 = vpop.eup %2318  ;;  %v1940_v22 = vsel %vm269_vm2, %v1939_v63, %v1938_v18  ;;  %v1943_v49 = vrot.slane %v3568_v60, 4 }
 0x3e5   :  { %v3578_v5 = vpop.eup %2320  ;;  %v928_v13 = vrot.slane %v3573_v58, 1  ;;  %v1942_v41 = vsel %vm271_vm3, %v1941_v3, %v1940_v22 }
 0x3e6   :  { %v3582_v6 = vpop.eup %2322  ;;  %v1944_v43 = vsel %vm273_vm4, %v1943_v49, %v1942_v41  ;;  %v1945_v39 = vrot.slane %v3578_v5, 3 }
 0x3e7   :  { %v3586_v50 = vpop.eup %2324  ;;  %v929_v37 = vsel %vm279_vm7, %v928_v13, %v927_v59  ;;  %v1947_v10 = vrot.slane %v3582_v6, 2 }
 0x3e8   :  { %v946_v40 = vsel %vm106_vm0, %v929_v37, 0.0  ;;  %v1946_v0 = vsel %vm275_vm5, %v1945_v39, %v1944_v43  ;;  %v1949_v35 = vrot.slane %v3586_v50, 1 }
 0x3e9   :  { %947 = vadd.xlane.f32.xlu0 %v946_v40  ;;  %v1948_v4 = vsel %vm277_vm6, %v1947_v10, %v1946_v0 }
 0x3ea   :  { %v1950_v7 = vsel %vm279_vm7, %v1949_v35, %v1948_v4 }
 0x3eb   :  { %v1967_v52 = vsel %vm106_vm0, %v1950_v7, 0.0 }
 0x3ed   :  { %1968 = vadd.xlane.f32.xlu0 %v1967_v52 }
 0x3f5   :  { %v819_v31 = vpop.xlane.xlu1 %818 }
 0x3f6   :  { %v829_v16 = vrot.slane %v819_v31, 1  ;;  %v830_v63 = vrot.slane %v819_v31, 2  ;;  %v831_v18 = vrot.slane %v819_v31, 3  ;;  %v832_v3 = vrot.slane %v819_v31, 4 }
 0x3f7   :  { %v833_v59 = vrot.slane %v819_v31, 5  ;;  %v834_v22 = vrot.slane %v819_v31, 6  ;;  %v860_v49 = vsub.f32 %v3447_v56, %v819_v31  ;;  %v835_v37 = vrot.slane %v819_v31, 7 }
 0x3f8   :  { %v861_v13 = vsub.f32 %v3429_v12, %v829_v16  ;;  %v862_v41 = vsub.f32 %v3432_v24, %v830_v63  ;;  %v863_v43 = vsub.f32 %v3435_v28, %v831_v18  ;;  %v864_v39 = vsub.f32 %v3438_v21, %v832_v3 }
 0x3f9   :  { %v884_v10 = vmul.f32 1.442695, %v860_v49  ;;  %v865_v4 = vsub.f32 %v3441_v1, %v833_v59  ;;  %v866_v52 = vsub.f32 %v3444_v20, %v834_v22  ;;  %v867_v12 = vsub.f32 %v3450_v15, %v835_v37 }
 0x3fa   :  { %v886_v40 = vmul.f32 1.442695, %v861_v13  ;;  %v888_v0 = vmul.f32 1.442695, %v862_v41  ;;  %v890_v35 = vmul.f32 1.442695, %v863_v43 }
 0x3fb   :  { %2326 = vpow2.f32 %v884_v10  ;;  %v892_v7 = vmul.f32 1.442695, %v864_v39  ;;  %v894_v24 = vmul.f32 1.442695, %v865_v4  ;;  %v896_v28 = vmul.f32 1.442695, %v866_v52 }
 0x3fc   :  { %2328 = vpow2.f32 %v886_v40 }
 0x3fd   :  { %2330 = vpow2.f32 %v888_v0 }
 0x3fe   :  { %2332 = vpow2.f32 %v890_v35 }
 0x3ff   :  { %2334 = vpow2.f32 %v892_v7  ;;  %v1840_v56 = vpop.xlane.xlu1 %1839 }
 0x400   :  { %v1850_v21 = vrot.slane %v1840_v56, 1  ;;  %v1851_v31 = vrot.slane %v1840_v56, 2  ;;  %v1852_v16 = vrot.slane %v1840_v56, 3  ;;  %v1853_v63 = vrot.slane %v1840_v56, 4 }
 0x401   :  { %v1854_v18 = vrot.slane %v1840_v56, 5  ;;  %v1855_v3 = vrot.slane %v1840_v56, 6  ;;  %v1856_v1 = vrot.slane %v1840_v56, 7  ;;  %v1881_v59 = vsub.f32 %v3489_v51, %v1840_v56 }
 0x402   :  { %v1882_v20 = vsub.f32 %v3476_v46, %v1850_v21  ;;  %v1883_v22 = vsub.f32 %v3479_v54, %v1851_v31  ;;  %v1884_v49 = vsub.f32 %v3483_v62, %v1852_v16  ;;  %v1885_v13 = vsub.f32 %v3486_v19, %v1853_v63 }
 0x403   :  { %v1886_v15 = vsub.f32 %v3492_v27, %v1854_v18  ;;  %v1905_v41 = vmul.f32 1.442695, %v1881_v59  ;;  %2336 = vpow2.f32 %v894_v24  ;;  %v1887_v43 = vsub.f32 %v3497_v42, %v1855_v3 }
 0x404   :  { %v1907_v39 = vmul.f32 1.442695, %v1882_v20  ;;  %v1909_v37 = vmul.f32 1.442695, %v1883_v22  ;;  %v1911_v10 = vmul.f32 1.442695, %v1884_v49  ;;  %2338 = vpow2.f32 %v896_v28 }
 0x405   :  { %v3611_v40 = vpop.eup %2326  ;;  %2340 = vpow2.f32 %v1905_v41  ;;  %v1913_v46 = vmul.f32 1.442695, %v1885_v13  ;;  %v1888_v54 = vsub.f32 %v3500_v44, %v1856_v1  ;;  %v898_v62 = vmul.f32 1.442695, %v867_v12 }
 0x406   :  { %v3614_v51 = vpop.eup %2328  ;;  %2342 = vpow2.f32 %v1907_v39  ;;  %v1915_v42 = vmul.f32 1.442695, %v1886_v15  ;;  %v1917_v4 = vmul.f32 1.442695, %v1887_v43 }
 0x407   :  { %v3616_v19 = vpop.eup %2330  ;;  %2344 = vpow2.f32 %v1909_v37  ;;  %v930_v27 = vrot.slane %v3614_v51, 7  ;;  %v1919_v56 = vmul.f32 1.442695, %v1888_v54 }
 0x408   :  { %v3619_v0 = vpop.eup %2332  ;;  %2346 = vpow2.f32 %v1911_v10  ;;  %v932_v35 = vrot.slane %v3616_v19, 6 }
 0x409   :  { %v3622_v7 = vpop.eup %2334  ;;  %2348 = vpow2.f32 %v1913_v46  ;;  %v931_v44 = vsel %vm267_vm1, %v930_v27, %v3611_v40  ;;  %v934_v52 = vrot.slane %v3619_v0, 5 }
 0x40a   :  { %2350 = vpow2.f32 %v898_v62  ;;  %v933_v12 = vsel %vm269_vm2, %v932_v35, %v931_v44  ;;  %v936_v28 = vrot.slane %v3622_v7, 4 }
 0x40b   :  { %v935_v24 = vsel %vm271_vm3, %v934_v52, %v933_v12  ;;  %2352 = vpow2.f32 %v1915_v42 }
 0x40c   :  { %2354 = vpow2.f32 %v1917_v4  ;;  %v937_v16 = vsel %vm273_vm4, %v936_v28, %v935_v24 }
 0x40d   :  { %v3630_v21 = vpop.eup %2336  ;;  %2356 = vpow2.f32 %v1919_v56 }
 0x40e   :  { %v3632_v31 = vpop.eup %2338  ;;  %v938_v18 = vrot.slane %v3630_v21, 3 }
 0x40f   :  { %v3635_v63 = vpop.eup %2340  ;;  %v940_v49 = vrot.slane %v3632_v31, 2 }
 0x410   :  { %v3638_v3 = vpop.eup %2342  ;;  %v939_v59 = vsel %vm275_vm5, %v938_v18, %v937_v16 }
 0x411   :  { %v3640_v1 = vpop.eup %2344  ;;  %v1951_v20 = vrot.slane %v3638_v3, 7  ;;  %v941_v37 = vsel %vm277_vm6, %v940_v49, %v939_v59 }
 0x412   :  { %v3644_v22 = vpop.eup %2346  ;;  %v1953_v13 = vrot.slane %v3640_v1, 6 }
 0x413   :  { %v3648_v15 = vpop.eup %2348  ;;  %v1952_v41 = vsel %vm267_vm1, %v1951_v20, %v3635_v63  ;;  %v1955_v43 = vrot.slane %v3644_v22, 5 }
 0x414   :  { %v3653_v39 = vpop.eup %2350  ;;  %v1954_v10 = vsel %vm269_vm2, %v1953_v13, %v1952_v41  ;;  %v1957_v46 = vrot.slane %v3648_v15, 4 }
 0x415   :  { %v3658_v54 = vpop.eup %2352  ;;  %v942_v62 = vrot.slane %v3653_v39, 1  ;;  %v1956_v27 = vsel %vm271_vm3, %v1955_v43, %v1954_v10 }
 0x416   :  { %v3662_v42 = vpop.eup %2354  ;;  %v1958_v35 = vsel %vm273_vm4, %v1957_v46, %v1956_v27  ;;  %v1959_v4 = vrot.slane %v3658_v54, 3 }
 0x417   :  { %v3666_v44 = vpop.eup %2356  ;;  %v943_v52 = vsel %vm279_vm7, %v942_v62, %v941_v37  ;;  %v1961_v56 = vrot.slane %v3662_v42, 2 }
 0x418   :  { %v949_v12 = vsel %vm106_vm0, %v943_v52, 0.0  ;;  %v1960_v24 = vsel %vm275_vm5, %v1959_v4, %v1958_v35  ;;  %v1963_v28 = vrot.slane %v3666_v44, 1 }
 0x419   :  { %950 = vadd.xlane.f32.xlu1 %v949_v12  ;;  %v1962_v16 = vsel %vm277_vm6, %v1961_v56, %v1960_v24 }
 0x41a   :  { %v1964_v18 = vsel %vm279_vm7, %v1963_v28, %v1962_v16 }
 0x41b   :  { %v1970_v59 = vsel %vm106_vm0, %v1964_v18, 0.0 }
 0x41d   :  { %1971 = vadd.xlane.f32.xlu1 %v1970_v59 }
 0x476   :  { %v948_v20 = vpop.xlane.xlu0 %947 }
 0x477   :  { %2358 = vrcp.f32 %v948_v20 }
 0x47a   :  { %v1969_v49 = vpop.xlane.xlu0 %1968 }
 0x47b   :  { %2360 = vrcp.f32 %v1969_v49 }
 0x481   :  { %v2359_v13 = vpop.eup %2358 }
 0x482   :  { %v956_v41 = vrot.slane %v2359_v13, 1  ;;  %v957_v43 = vrot.slane %v2359_v13, 2  ;;  %v958_v37 = vrot.slane %v2359_v13, 3  ;;  %v959_v10 = vrot.slane %v2359_v13, 4 }
 0x483   :  { %v960_v46 = vrot.slane %v2359_v13, 5  ;;  %v961_v62 = vrot.slane %v2359_v13, 6  ;;  %v962_v27 = vrot.slane %v2359_v13, 7  ;;  %v986_v35 = vmul.f32 %v2359_v13, %v3531_v14 }
 0x484   :  { %v987_v4 = vmul.f32 %v3534_v36, %v956_v41  ;;  %v988_v52 = vmul.f32 %v3536_v9, %v957_v43  ;;  %v989_v56 = vmul.f32 %v3539_v25, %v958_v37  ;;  %v990_v12 = vmul.f32 %v3542_v32, %v959_v10 }
 0x485   :  { %v2361_v24 = vpop.eup %2360  ;;  %v991_v28 = vmul.f32 %v3550_v45, %v960_v46  ;;  %v992_v16 = vmul.f32 %v3552_v26, %v961_v62  ;;  %v993_v18 = vmul.f32 %v3573_v58, %v962_v27  ;;  %v1002_v9 = vmul.f32 %v986_v35, %v2671_v8 }
 0x486   :  { %v1003_v59 = vmul.f32 %v987_v4, %v2673_v29  ;;  %v1004_v20 = vmul.f32 %v988_v52, %v2679_v17  ;;  %v1005_v14 = vmul.f32 %v989_v56, %v2681_v34  ;;  %v1006_v36 = vmul.f32 %v990_v12, %v2694_v33 }
 0x487   :  { %v1007_v25 = vmul.f32 %v991_v28, %v2726_v2  ;;  %v1008_v32 = vmul.f32 %v992_v16, %v2744_v11  ;;  %v1009_v45 = vmul.f32 %v993_v18, %v2758_v38  ;;  %v1977_v13 = vrot.slane %v2361_v24, 1  ;;  %v3987_v18 = vld [vmem:[#allocation13_spill] sm:$0xff] }
 0x488   :  { %v1034_v49 = vrot.slane %v1003_v59, 7  ;;  %v1036_v26 = vrot.slane %v1004_v20, 6  ;;  %v1038_v58 = vrot.slane %v1005_v14, 5  ;;  %v1040_v41 = vrot.slane %v1006_v36, 4  ;;  %v3988_v59 = vld [vmem:[#allocation14_spill] sm:$0xff] }
 0x489   :  { %v1042_v29 = vrot.slane %v1007_v25, 3  ;;  %v1978_v43 = vrot.slane %v2361_v24, 2  ;;  %v1979_v34 = vrot.slane %v2361_v24, 3  ;;  %v1980_v37 = vrot.slane %v2361_v24, 4 }
 0x48a   :  { %v1035_v17 = vsel %vm267_vm1, %v1034_v49, %v1002_v9  ;;  %v1981_v33 = vrot.slane %v2361_v24, 5  ;;  %v1982_v10 = vrot.slane %v2361_v24, 6  ;;  %v1983_v2 = vrot.slane %v2361_v24, 7 }
 0x48b   :  { %v1037_v8 = vsel %vm269_vm2, %v1036_v26, %v1035_v17  ;;  %v2007_v11 = vmul.f32 %v2361_v24, %v3555_v57  ;;  %v2008_v46 = vmul.f32 %v3558_v53, %v1977_v13  ;;  %v2009_v62 = vmul.f32 %v3560_v23, %v1978_v43  ;;  %v3986_v24 = vld [vmem:[#allocation12_spill] sm:$0xff]  ;;  %v3992_v26 = vld [vmem:[#allocation17_spill] sm:$0xff] }
 0x48c   :  { %v1039_v38 = vsel %vm271_vm3, %v1038_v58, %v1037_v8  ;;  %v2010_v27 = vmul.f32 %v3564_v61, %v1979_v34  ;;  %v1044_v4 = vrot.slane %v1008_v32, 2  ;;  %v2011_v52 = vmul.f32 %v3568_v60, %v1980_v37  ;;  %v3989_v60 = vld [vmem:[#allocation11_spill] sm:$0xff]  ;;  %v3991_v32 = vld [vmem:[#allocation16_spill] sm:$0xff] }
 0x48d   :  { %v1041_v35 = vsel %vm273_vm4, %v1040_v41, %v1039_v38  ;;  %v2012_v56 = vmul.f32 %v3578_v5, %v1981_v33  ;;  %v1046_v28 = vrot.slane %v1009_v45, 1  ;;  %v2013_v57 = vmul.f32 %v3582_v6, %v1982_v10  ;;  %v3990_v5 = vld [vmem:[#allocation15_spill] sm:$0xff] }
 0x48e   :  { %v1043_v12 = vsel %vm275_vm5, %v1042_v29, %v1041_v35  ;;  %v2024_v16 = vmul.f32 %v2008_v46, %v3986_v24  ;;  %v2014_v23 = vmul.f32 %v3586_v50, %v1983_v2  ;;  %v2025_v61 = vmul.f32 %v2009_v62, %v3987_v18  ;;  %v3993_v50 = vld [vmem:[#allocation18_spill] sm:$0xff] }
 0x48f   :  { %v1045_v53 = vsel %vm277_vm6, %v1044_v4, %v1043_v12  ;;  %v2026_v20 = vmul.f32 %v2010_v27, %v3988_v59  ;;  %v2023_v36 = vmul.f32 %v2007_v11, %v3989_v60  ;;  %v2027_v9 = vmul.f32 %v2011_v52, %v3990_v5  ;;  %v3994_v5 = vld [vmem:[#allocation28_spill] sm:$0xff] }
 0x490   :  { %v1047_v14 = vsel %vm279_vm7, %v1046_v28, %v1045_v53  ;;  %v2028_v6 = vmul.f32 %v2012_v56, %v3991_v32  ;;  %v2055_v45 = vrot.slane %v2024_v16, 7  ;;  %v2057_v49 = vrot.slane %v2025_v61, 6 }
 0x491   :  { %v1064_v25 = vsel %vm106_vm0, %v1047_v14, 0.0  ;;  %v2029_v13 = vmul.f32 %v2013_v57, %v3992_v26  ;;  %v2030_v58 = vmul.f32 %v2014_v23, %v3993_v50  ;;  %v2059_v29 = vrot.slane %v2026_v20, 5  ;;  %v4000_v26 = vld [vmem:[#allocation33_spill] sm:$0xff] }
 0x492   :  { %1065 = vadd.xlane.f32.xlu0 %v1064_v25  ;;  %v2056_v41 = vsel %vm267_vm1, %v2055_v45, %v2023_v36  ;;  %v2061_v17 = vrot.slane %v2027_v9, 4  ;;  %v2063_v37 = vrot.slane %v2028_v6, 3 }
 0x493   :  { %v2058_v43 = vsel %vm269_vm2, %v2057_v49, %v2056_v41  ;;  %v2065_v8 = vrot.slane %v2029_v13, 2  ;;  %v2067_v2 = vrot.slane %v2030_v58, 1 }
 0x494   :  { %v2060_v34 = vsel %vm271_vm3, %v2059_v29, %v2058_v43 }
 0x495   :  { %v2062_v33 = vsel %vm273_vm4, %v2061_v17, %v2060_v34 }
 0x496   :  { %v2064_v10 = vsel %vm275_vm5, %v2063_v37, %v2062_v33 }
 0x497   :  { %v2066_v11 = vsel %vm277_vm6, %v2065_v8, %v2064_v10 }
 0x498   :  { %v2068_v38 = vsel %vm279_vm7, %v2067_v2, %v2066_v11 }
 0x499   :  { %v2085_v46 = vsel %vm106_vm0, %v2068_v38, 0.0 }
 0x49a   :  { %2086 = vadd.xlane.f32.xlu0 %v2085_v46 }
 0x4a6   :  { %v951_v62 = vpop.xlane.xlu1 %950 }
 0x4a7   :  { %2362 = vrcp.f32 %v951_v62 }
 0x4aa   :  { %v1972_v27 = vpop.xlane.xlu1 %1971 }
 0x4ab   :  { %2364 = vrcp.f32 %v1972_v27 }
 0x4b1   :  { %v2363_v35 = vpop.eup %2362 }
 0x4b2   :  { %v963_v4 = vrot.slane %v2363_v35, 1  ;;  %v964_v52 = vrot.slane %v2363_v35, 2  ;;  %v965_v56 = vrot.slane %v2363_v35, 3  ;;  %v966_v12 = vrot.slane %v2363_v35, 4 }
 0x4b3   :  { %v967_v28 = vrot.slane %v2363_v35, 5  ;;  %v968_v57 = vrot.slane %v2363_v35, 6  ;;  %v969_v24 = vrot.slane %v2363_v35, 7  ;;  %v994_v16 = vmul.f32 %v2363_v35, %v3611_v40  ;;  %v3995_v40 = vld [vmem:[#allocation29_spill] sm:$0xff] }
 0x4b4   :  { %v995_v53 = vmul.f32 %v3614_v51, %v963_v4  ;;  %v996_v23 = vmul.f32 %v3616_v19, %v964_v52  ;;  %v997_v18 = vmul.f32 %v3619_v0, %v965_v56  ;;  %v998_v61 = vmul.f32 %v3622_v7, %v966_v12  ;;  %v3996_v51 = vld [vmem:[#allocation30_spill] sm:$0xff]  ;;  %v3997_v19 = vld [vmem:[#allocation27_spill] sm:$0xff]  ;;  %v3999_v7 = vld [vmem:[#allocation32_spill] sm:$0xff] }
 0x4b5   :  { %v2365_v59 = vpop.eup %2364  ;;  %v999_v20 = vmul.f32 %v3630_v21, %v967_v28  ;;  %v1000_v14 = vmul.f32 %v3632_v31, %v968_v57  ;;  %v1001_v60 = vmul.f32 %v3653_v39, %v969_v24  ;;  %v1010_v6 = vmul.f32 %v994_v16, %v3997_v19  ;;  %v3998_v0 = vld [vmem:[#allocation31_spill] sm:$0xff] }
 0x4b6   :  { %v1011_v36 = vmul.f32 %v995_v53, %v2863_v55  ;;  %v1012_v9 = vmul.f32 %v996_v23, %v3994_v5  ;;  %v1013_v25 = vmul.f32 %v997_v18, %v3995_v40  ;;  %v1014_v32 = vmul.f32 %v998_v61, %v3996_v51  ;;  %v4003_v23 = vld [vmem:[#allocation24_spill] sm:$0xff]  ;;  %v4004_v61 = vld [vmem:[#allocation25_spill] sm:$0xff] }
 0x4b7   :  { %v1015_v45 = vmul.f32 %v999_v20, %v3998_v0  ;;  %v1016_v49 = vmul.f32 %v1000_v14, %v3999_v7  ;;  %v1017_v21 = vmul.f32 %v1001_v60, %v4000_v26  ;;  %v1984_v50 = vrot.slane %v2365_v59, 1 }
 0x4b8   :  { %v1048_v13 = vrot.slane %v1011_v36, 7  ;;  %v1050_v31 = vrot.slane %v1012_v9, 6  ;;  %v1052_v39 = vrot.slane %v1013_v25, 5  ;;  %v1054_v58 = vrot.slane %v1014_v32, 4 }
 0x4b9   :  { %v1056_v55 = vrot.slane %v1015_v45, 3  ;;  %v1985_v41 = vrot.slane %v2365_v59, 2  ;;  %v1986_v43 = vrot.slane %v2365_v59, 3  ;;  %v1987_v17 = vrot.slane %v2365_v59, 4 }
 0x4ba   :  { %v1049_v29 = vsel %vm267_vm1, %v1048_v13, %v1010_v6  ;;  %v1988_v34 = vrot.slane %v2365_v59, 5  ;;  %v1989_v33 = vrot.slane %v2365_v59, 6  ;;  %v1990_v8 = vrot.slane %v2365_v59, 7 }
 0x4bb   :  { %v1051_v37 = vsel %vm269_vm2, %v1050_v31, %v1049_v29  ;;  %v2015_v10 = vmul.f32 %v2365_v59, %v3635_v63  ;;  %v2016_v11 = vmul.f32 %v3638_v3, %v1984_v50  ;;  %v2017_v38 = vmul.f32 %v3640_v1, %v1985_v41 }
 0x4bc   :  { %v1053_v2 = vsel %vm271_vm3, %v1052_v39, %v1051_v37  ;;  %v2018_v46 = vmul.f32 %v3644_v22, %v1986_v43  ;;  %v1058_v27 = vrot.slane %v1016_v49, 2  ;;  %v2019_v35 = vmul.f32 %v3648_v15, %v1987_v17  ;;  %v4001_v15 = vld [vmem:[#allocation19_spill] sm:$0xff] }
 0x4bd   :  { %v1055_v62 = vsel %vm273_vm4, %v1054_v58, %v1053_v2  ;;  %v2020_v4 = vmul.f32 %v3658_v54, %v1988_v34  ;;  %v1060_v56 = vrot.slane %v1017_v21, 1  ;;  %v2021_v63 = vmul.f32 %v3662_v42, %v1989_v33  ;;  %v4002_v54 = vld [vmem:[#allocation23_spill] sm:$0xff] }
 0x4be   :  { %v1057_v52 = vsel %vm275_vm5, %v1056_v55, %v1055_v62  ;;  %v2032_v12 = vmul.f32 %v2016_v11, %v3947_v47  ;;  %v2022_v1 = vmul.f32 %v3666_v44, %v1990_v8  ;;  %v2033_v22 = vmul.f32 %v2017_v38, %v3948_v48  ;;  %v4005_v44 = vld [vmem:[#allocation26_spill] sm:$0xff] }
 0x4bf   :  { %v1059_v3 = vsel %vm277_vm6, %v1058_v27, %v1057_v52  ;;  %v2034_v28 = vmul.f32 %v2018_v46, %v3949_v30  ;;  %v2031_v24 = vmul.f32 %v2015_v10, %v4001_v15  ;;  %v2035_v16 = vmul.f32 %v2019_v35, %v4002_v54 }
 0x4c0   :  { %v1061_v57 = vsel %vm279_vm7, %v1060_v56, %v1059_v3  ;;  %v2036_v42 = vmul.f32 %v2020_v4, %v4003_v23  ;;  %v2069_v18 = vrot.slane %v2032_v12, 7  ;;  %v2071_v47 = vrot.slane %v2033_v22, 6 }
 0x4c1   :  { %v1067_v53 = vsel %vm106_vm0, %v1061_v57, 0.0  ;;  %v2037_v59 = vmul.f32 %v2021_v63, %v4004_v61  ;;  %v2038_v20 = vmul.f32 %v2022_v1, %v4005_v44  ;;  %v2073_v30 = vrot.slane %v2034_v28, 5 }
 0x4c2   :  { %1068 = vadd.xlane.f32.xlu1 %v1067_v53  ;;  %v2070_v48 = vsel %vm267_vm1, %v2069_v18, %v2031_v24  ;;  %v2075_v60 = vrot.slane %v2035_v16, 4  ;;  %v2077_v5 = vrot.slane %v2036_v42, 3  ;;  %v2458_v0 = vmov 0  }
 0x4c3   :  { %v2072_v14 = vsel %vm269_vm2, %v2071_v47, %v2070_v48  ;;  %v2079_v40 = vrot.slane %v2037_v59, 2  ;;  %v2081_v51 = vrot.slane %v2038_v20, 1  ;;  %2188 = vset.pattern.permute.xlu0 %v2458_v0  ;;  %2189 = vset.pattern.permute.xlu1 %v2458_v0 }
 0x4c4   :  { %v2074_v36 = vsel %vm271_vm3, %v2073_v30, %v2072_v14 }
 0x4c5   :  { %v2076_v9 = vsel %vm273_vm4, %v2075_v60, %v2074_v36 }
 0x4c6   :  { %v2078_v25 = vsel %vm275_vm5, %v2077_v5, %v2076_v9 }
 0x4c7   :  { %v2080_v32 = vsel %vm277_vm6, %v2079_v40, %v2078_v25 }
 0x4c8   :  { %v2082_v19 = vsel %vm279_vm7, %v2081_v51, %v2080_v32  ;;  %v2137_v32 = vlaneseq }
 0x4c9   :  { %v2088_v6 = vsel %vm106_vm0, %v2082_v19, 0.0 }
 0x4ca   :  { %2089 = vadd.xlane.f32.xlu1 %v2088_v6  ;;  %v2138_v19 = vand.u32 127, %v2137_v32  ;;  %v2140_v6 = vshrl.u32 %v2137_v32, 7 }
 0x4cc   :  { %v2141_v0 = vsub.s32 %v2138_v19, %v2140_v6 }
 0x51f   :  { %v1066_v45 = vpop.xlane.xlu0 %1065 }
 0x520   :  { %v1070_v7 = vmul.f32 %v1066_v45, %v1066_v45 }
 0x522   :  { %v1072_v49 = vrot.slane %v1070_v7, 4 }
 0x524   :  { %v1073_v26 = vadd.f32 %v1072_v49, %v1070_v7 }
 0x526   :  { %v1074_v21 = vrot.slane %v1073_v26, 2 }
 0x527   :  { %v2087_v29 = vpop.xlane.xlu0 %2086 }
 0x528   :  { %v1075_v13 = vadd.f32 %v1074_v21, %v1073_v26  ;;  %v2091_v34 = vmul.f32 %v2087_v29, %v2087_v29 }
 0x52a   :  { %v1076_v31 = vrot.slane %v1075_v13, 1  ;;  %v2093_v33 = vrot.slane %v2091_v34, 4 }
 0x52c   :  { %v1077_v50 = vadd.f32 %v1076_v31, %v1075_v13  ;;  %v2094_v8 = vadd.f32 %v2093_v33, %v2091_v34 }
 0x52e   :  { %v1084_v39 = vadd.f32 1e-12, %v1077_v50  ;;  %v1090_v58 = vadd.f32 1.0, %v1077_v50  ;;  %v2095_v10 = vrot.slane %v2094_v8, 2 }
 0x530   :  { %2366 = vrsqrt.f32 %v1084_v39  ;;  %v2096_v2 = vadd.f32 %v2095_v10, %v2094_v8 }
 0x531   :  { %2368 = vrcp.f32 %v1090_v58 }
 0x532   :  { %v2097_v62 = vrot.slane %v2096_v2, 1 }
 0x534   :  { %v2098_v4 = vadd.f32 %v2097_v62, %v2096_v2 }
 0x536   :  { %v2105_v3 = vadd.f32 1e-12, %v2098_v4  ;;  %v2111_v54 = vadd.f32 1.0, %v2098_v4 }
 0x538   :  { %2370 = vrsqrt.f32 %v2105_v3 }
 0x53a   :  { %v2367_v55 = vpop.eup %2366 }
 0x53b   :  { %v1088_v41 = vmul.f32 %v2367_v55, %v1077_v50  ;;  %v2369_v43 = vpop.eup %2368 }
 0x53d   :  { %v1094_v17 = vmul.f32 %v2369_v43, %v1088_v41 }
 0x53f   :  { %v1096_v37 = vmul.f32 %v1094_v17, %v1066_v45 }
 0x541   :  { %2126 = vperm.xlu0 %2188, %v1096_v37  }
 0x542   :  { %v2371_v47 = vpop.eup %2370 }
 0x543   :  { %v2109_v44 = vmul.f32 %v2371_v47, %v2098_v4 }
 0x54f   :  { %v1069_v11 = vpop.xlane.xlu1 %1068 }
 0x550   :  { %v1071_v38 = vmul.f32 %v1069_v11, %v1069_v11 }
 0x552   :  { %v1078_v46 = vrot.slane %v1071_v38, 4 }
 0x554   :  { %v1079_v27 = vadd.f32 %v1078_v46, %v1071_v38 }
 0x556   :  { %v1080_v35 = vrot.slane %v1079_v27, 2 }
 0x557   :  { %v2090_v56 = vpop.xlane.xlu1 %2089 }
 0x558   :  { %v1081_v52 = vadd.f32 %v1080_v35, %v1079_v27  ;;  %v2092_v63 = vmul.f32 %v2090_v56, %v2090_v56 }
 0x55a   :  { %v1082_v12 = vrot.slane %v1081_v52, 1  ;;  %v2099_v1 = vrot.slane %v2092_v63, 4 }
 0x55c   :  { %v1083_v22 = vadd.f32 %v1082_v12, %v1081_v52  ;;  %v2100_v28 = vadd.f32 %v2099_v1, %v2092_v63 }
 0x55e   :  { %v1085_v57 = vadd.f32 1e-12, %v1083_v22  ;;  %v1091_v15 = vadd.f32 1.0, %v1083_v22  ;;  %v2101_v24 = vrot.slane %v2100_v28, 2 }
 0x560   :  { %2372 = vrsqrt.f32 %v1085_v57  ;;  %v2102_v16 = vadd.f32 %v2101_v24, %v2100_v28 }
 0x561   :  { %2374 = vrcp.f32 %v1091_v15 }
 0x562   :  { %v2103_v53 = vrot.slane %v2102_v16, 1  ;;  %2376 = vrcp.f32 %v2111_v54 }
 0x564   :  { %v2104_v23 = vadd.f32 %v2103_v53, %v2102_v16 }
 0x566   :  { %v2106_v42 = vadd.f32 1e-12, %v2104_v23  ;;  %v2112_v18 = vadd.f32 1.0, %v2104_v23 }
 0x568   :  { %2378 = vrsqrt.f32 %v2106_v42 }
 0x569   :  { %2380 = vrcp.f32 %v2112_v18 }
 0x56a   :  { %v2373_v61 = vpop.eup %2372 }
 0x56b   :  { %v1089_v59 = vmul.f32 %v2373_v61, %v1083_v22  ;;  %v2375_v20 = vpop.eup %2374 }
 0x56c   :  { %v2377_v30 = vpop.eup %2376 }
 0x56d   :  { %v1095_v48 = vmul.f32 %v2375_v20, %v1089_v59  ;;  %v2115_v60 = vmul.f32 %v2377_v30, %v2109_v44 }
 0x56f   :  { %v1097_v14 = vmul.f32 %v1095_v48, %v1069_v11  ;;  %v2117_v5 = vmul.f32 %v2115_v60, %v2087_v29 }
 0x571   :  { %2129 = vperm.xlu1 %2189, %v1097_v14  }
 0x572   :  { %v2379_v36 = vpop.eup %2378 }
 0x573   :  { %v2110_v9 = vmul.f32 %v2379_v36, %v2104_v23  ;;  %v2381_v40 = vpop.eup %2380 }
 0x575   :  { %2132 = vperm.xlu1 %2189, %v2117_v5   ;;  %v2116_v25 = vmul.f32 %v2381_v40, %v2110_v9 }
 0x577   :  { %v2118_v51 = vmul.f32 %v2116_v25, %v2090_v56 }
 0x579   :  { %2135 = vperm.xlu1 %2189, %v2118_v51  }
 0x5c0   :  { %v2127_v45 = vpop.permute.xlu0 %2126 }
 0x5c1   :  { %v2142_v49 = vrot.slane %v2127_v45, %v2141_v0 }
 0x5f0   :  { %v2130_v7 = vpop.permute.xlu1 %2129 }
 0x5f1   :  { %v2146_v26 = vrot.slane %v2130_v7, %v2141_v0 }
 0x5f3   :  { %v2155_v21 = vsel %vm267_vm1, %v2146_v26, %v2142_v49 }
 0x5f4   :  { %2160 = vst.msk [vmem:[#allocation7] sm:$0x3] %vm2159_vm8, %v2155_v21  ;;  %v2133_v13 = vpop.permute.xlu1 %2132 }
 0x5f5   :  { %v2150_v50 = vrot.slane %v2133_v13, %v2141_v0 }
 0x5f8   :  { %v2136_v31 = vpop.permute.xlu1 %2135 }
 0x5f9   :  { %v2154_v39 = vrot.slane %v2136_v31, %v2141_v0 }
 0x5fb   :  { %v2156_v58 = vsel %vm267_vm1, %v2154_v39, %v2150_v50 }
 0x5fc   :  { %2161 = vst.msk [vmem:[#allocation7 + $0x2] sm:$0x3] %vm2159_vm8, %v2156_v58 }
 0x5fd   :  { %2437 = shalt.err (!%p2434_p6)
}
 0x5fe   :  { %s2438_s10 = scalar_lea.hbm %s3788_s2, 64 }
 0x5ff   :  { %p2439_p7 = scmp.ne.s32.totalorder %s3788_s2, %s2438_s10  ;;  %p2442_p8 = scmp.lt.u32.totalorder %s2438_s10, %s3788_s2 }
 0x601   :  { %p2444_p9 = pnand %p2442_p8, %p2439_p7 }
 0x603   :  { %2447 = shalt.err (!%p2444_p9)
}
 0x604   :  { %s2460_s15 = smov 32   ;;  %s2461_s16 = smov 2  }
 0x605   :  { %2173 = dma.vmem_to_hbm [thread:$0]  %s2168_s6, 64, %s3788_s2, [#allocation4], %s2460_s15, %s2460_s15, %s2461_s16  }
 0x606   :  { %2452 = dma.done.wait [#allocation4], 64  }
 0x607   :  { %2453 = vsyncadd [#allocation4], 4294967232 }
 0x608   :  { %2177 = vsyncpa [#allocation3], 1 }
 0x609   :  { %2178 = vsyncpa [#allocation6], 1 }
 0x60a   :  { %2179 = vsyncpa [#allocation4], 1 }

</bundles_post_ra>
